<compile_context>
chip_gen: v7x
topology: tpu7x:2x2x1
jax: 0.10.0
libtpu: 0.0.40
codegen_flags: <defaults>
</compile_context>

<pallas_src>
import functools

import jax
import jax.numpy as jnp
from jax.experimental import pallas as pl
from jax.experimental.pallas import tpu as pltpu

STATE_DIM = 4
N_ROBOTS = 1
USE_OBJECT = 1
INPUT_DIM = STATE_DIM * (N_ROBOTS + USE_OBJECT)   # 8
HIDDEN_DIM = 128
HIDDEN_DEPTH = 2
OUTPUT_DIM = 512
MIN_BATCH_TILE = 256                  # full MXU rows, (8,128)-friendly
MAX_BATCH_TILE = 1024                 # 4-8x work per grid step vs. old 256
WEIGHT_DTYPE = jnp.bfloat16           # MXU-native; f32 accumulation retained
OUT_DTYPE = jnp.bfloat16              # halves output writeback (the bottleneck)


# ----------------------------------------------------------------------------
# Pallas kernel: fused MLP (standardization pre-folded into the first layer).
# ----------------------------------------------------------------------------
def rnd_mlp_kernel(x_ref, *refs, hidden_depth):
    # refs layout: w_in, b_in, [w_h_d, b_h_d] * depth, w_out, b_out, out_ref
    w_in_ref, b_in_ref = refs[0], refs[1]
    hidden_refs = refs[2:2 + 2 * hidden_depth]
    w_out_ref, b_out_ref = refs[2 + 2 * hidden_depth], refs[3 + 2 * hidden_depth]
    out_ref = refs[-1]

    # Input layer + ReLU.  (x - mean)/std is folded into w_in / b_in host-side;
    # x arrives already in bf16 (cast on the host, not in-kernel).
    # TODO(synk): on v7x the K=8 first-layer matmul could be 8 VPU FMAs instead
    # of an MXU pass; only worthwhile once the kernel is compute-bound.
    h = jnp.dot(x_ref[...], w_in_ref[...], preferred_element_type=jnp.float32)
    h = jnp.maximum(h + b_in_ref[...], 0.0)          # bias/ReLU in f32

    # Hidden stack (static unroll; hidden_depth is a Python int).
    for d in range(hidden_depth):
        w_ref, b_ref = hidden_refs[2 * d], hidden_refs[2 * d + 1]
        h = jnp.dot(h.astype(WEIGHT_DTYPE), w_ref[...],
                    preferred_element_type=jnp.float32)
        h = jnp.maximum(h + b_ref[...], 0.0)

    # Output layer (no activation).
    o = jnp.dot(h.astype(WEIGHT_DTYPE), w_out_ref[...],
                preferred_element_type=jnp.float32)
    out_ref[...] = (o + b_out_ref[...]).astype(out_ref.dtype)


# ----------------------------------------------------------------------------
# Host-side parameter prep: fold standardization, cast weights to bf16.
# ----------------------------------------------------------------------------
def _fold_standardization(params, eps=1e-6):
    """Fold (x - mean)/std into the first linear layer (f32 precompute).

    Note: the eps clamp on std is a guard the PyTorch module does not have
    (it divides by std directly); with the default std=1.0 it is a no-op.
    """
    std = jnp.maximum(params["std"].astype(jnp.float32), eps)
    mean = params["mean"].astype(jnp.float32)
    w_in = params["w_in"].astype(jnp.float32)                   # [IN, H]
    b_in = params["b_in"].astype(jnp.float32)                   # [1, H]
    w_fold = w_in / std[:, None]
    b_fold = b_in - (mean / std)[None, :] @ w_in
    return w_fold, b_fold


def _prepare_kernel_params(params):
    w_in_f, b_in_f = _fold_standardization(params)
    flat = [w_in_f.astype(WEIGHT_DTYPE), b_in_f.astype(jnp.float32)]
    for d in range(HIDDEN_DEPTH):
        flat += [params["w_h"][d].astype(WEIGHT_DTYPE),
                 params["b_h"][d].astype(jnp.float32)]
    flat += [params["w_out"].astype(WEIGHT_DTYPE),
             params["b_out"].astype(jnp.float32)]
    return flat


def _pick_batch_tile(batch):
    """Batch tile: multiple of 256, <= 1024, >= 2 grid steps when possible."""
    padded = MIN_BATCH_TILE * pl.cdiv(max(batch, 1), MIN_BATCH_TILE)
    half_tiles = (padded // 2) // MIN_BATCH_TILE        # aim for a 2-step grid
    tile = max(MIN_BATCH_TILE, MIN_BATCH_TILE * half_tiles)
    return min(MAX_BATCH_TILE, tile)


def rnd_forward_mlp(inputs, params, out_dtype=OUT_DTYPE):
    """Run the RND MLP on pre-processed inputs of shape [B, INPUT_DIM]."""
    B = inputs.shape[0]
    tile = _pick_batch_tile(B)
    padded_B = tile * pl.cdiv(B, tile)

    # Cast + pad host-side: halves the (small) input DMA and removes the
    # in-kernel f32->bf16 cast on an 8-lane-wide tile.
    x = inputs.astype(WEIGHT_DTYPE)
    if padded_B != B:
        x = jnp.pad(x, ((0, padded_B - B), (0, 0)))

    flat_params = _prepare_kernel_params(params)
    kernel = functools.partial(rnd_mlp_kernel, hidden_depth=HIDDEN_DEPTH)

    # Constant index maps keep all weights/biases resident in VMEM across grid.
    weight_specs = [
        pl.BlockSpec((INPUT_DIM, HIDDEN_DIM), lambda i: (0, 0)),    # w_in (folded)
        pl.BlockSpec((1, HIDDEN_DIM), lambda i: (0, 0)),            # b_in (folded)
    ]
    for _ in range(HIDDEN_DEPTH):
        weight_specs += [
            pl.BlockSpec((HIDDEN_DIM, HIDDEN_DIM), lambda i: (0, 0)),   # w_h[d]
            pl.BlockSpec((1, HIDDEN_DIM), lambda i: (0, 0)),            # b_h[d]
        ]
    weight_specs += [
        pl.BlockSpec((HIDDEN_DIM, OUTPUT_DIM), lambda i: (0, 0)),   # w_out
        pl.BlockSpec((1, OUTPUT_DIM), lambda i: (0, 0)),            # b_out
    ]

    out = pl.pallas_call(
        kernel,
        out_shape=jax.ShapeDtypeStruct((padded_B, OUTPUT_DIM), out_dtype),
        grid_spec=pltpu.PrefetchScalarGridSpec(
            num_scalar_prefetch=0,
            grid=(padded_B // tile,),
            in_specs=[pl.BlockSpec((tile, INPUT_DIM), lambda i: (i, 0))]
                     + weight_specs,
            out_specs=pl.BlockSpec((tile, OUTPUT_DIM), lambda i: (i, 0)),
        ),
        compiler_params=pltpu.CompilerParams(
            dimension_semantics=("parallel",)),       # megacore shards batch tiles
    )(x, *flat_params)
    return out[:B] if padded_B != B else out


# ----------------------------------------------------------------------------
# Plain-JAX glue: parameter init and input preprocessing.
# ----------------------------------------------------------------------------
def init_rnd_params(key):
    """Deterministic init of one RND network (target or predictor)."""
    def linear(k, fan_in, fan_out):
        kw, kb = jax.random.split(k)
        bound = 1.0 / jnp.sqrt(fan_in)
        w = jax.random.uniform(kw, (fan_in, fan_out), jnp.float32, -bound, bound)
        b = jax.random.uniform(kb, (1, fan_out), jnp.float32, -bound, bound)
        return w, b

    keys = jax.random.split(key, 2 + HIDDEN_DEPTH)
    w_in, b_in = linear(keys[0], INPUT_DIM, HIDDEN_DIM)
    w_h_list, b_h_list = [], []
    for d in range(HIDDEN_DEPTH):
        w, b = linear(keys[1 + d], HIDDEN_DIM, HIDDEN_DIM)
        w_h_list.append(w)
        b_h_list.append(b)
    w_out, b_out = linear(keys[-1], HIDDEN_DIM, OUTPUT_DIM)
    return {
        "w_in": w_in, "b_in": b_in,
        "w_h": w_h_list,                 # list of [H, H]
        "b_h": b_h_list,                 # list of [1, H]
        "w_out": w_out, "b_out": b_out,
        # self.input_mean = 0.0, self.input_std = 1.0 in __init__
        "mean": jnp.zeros((INPUT_DIM,), jnp.float32),
        "std": jnp.ones((INPUT_DIM,), jnp.float32),
    }


def preprocess_inputs(states, goals):
    """Approximate DataUtils.state_to_model_input + relative_goal_xysc.

    states: [B, 4*N_ROBOTS] as (x, y, sin(theta), cos(theta)) per robot.
    goals:  [B, 2] as (x, y).
    Returns [B, INPUT_DIM] = concat(robot xysc, relative-goal xysc).
    """
    # TODO(synk): DataUtils is not provided; this mirrors the "xysc" convention
    # (robot state passthrough + goal expressed relative to robot 0's pose) but
    # does not rotate (dx, dy) into the robot frame.
    input_states = states.astype(jnp.float32)
    dxy = goals[:, :2] - states[:, :2]
    sc = states[:, 2:4]
    input_goals = jnp.concatenate([dxy, sc], axis=1).astype(jnp.float32)
    return jnp.concatenate([input_states, input_goals], axis=1)


def rnd_forward(states, actions, goals, target_params, predictor_params,
                use_predictor=False, out_dtype=OUT_DTYPE):
    del actions  # unused in the original forward as well
    if states.ndim == 1:
        states = states[None, :]
    if goals.ndim == 1:
        goals = goals[None, :]
    inputs = preprocess_inputs(states, goals)
    params = predictor_params if use_predictor else target_params
    return rnd_forward_mlp(inputs, params, out_dtype=out_dtype)


# ----------------------------------------------------------------------------
# Reference (same bf16-weight / f32-accumulate math as the kernel).
# ----------------------------------------------------------------------------
def _mlp_reference(inputs, params):
    w_in_f, b_in_f = _fold_standardization(params)

    def dot_bf16(a, w):
        return jnp.dot(a.astype(WEIGHT_DTYPE), w.astype(WEIGHT_DTYPE),
                       preferred_element_type=jnp.float32)

    h = jnp.maximum(dot_bf16(inputs, w_in_f) + b_in_f, 0.0)
    for d in range(HIDDEN_DEPTH):
        h = jnp.maximum(dot_bf16(h, params["w_h"][d]) + params["b_h"][d], 0.0)
    return dot_bf16(h, params["w_out"]) + params["b_out"]


if __name__ == "__main__":
    key = jax.random.PRNGKey(0)
    k_tgt, k_pred, k_s, k_a, k_g = jax.random.split(key, 5)

    target_params = init_rnd_params(k_tgt)
    predictor_params = init_rnd_params(k_pred)

    # Small batch (consistent with the module): exercises padding to one tile.
    B = 4
    states = jax.random.normal(k_s, (B, STATE_DIM * N_ROBOTS), jnp.float32)
    actions = jax.random.normal(k_a, (B, 2), jnp.float32)
    goals = jax.random.normal(k_g, (B, 2), jnp.float32)

    out = rnd_forward(states, actions, goals, target_params, predictor_params,
                      use_predictor=False)
    out = jax.block_until_ready(out)

    # Sanity check vs. pure-JAX reference (identical bf16/f32-acc math; the
    # tolerance also covers the bf16 output cast).
    ref = _mlp_reference(preprocess_inputs(states, goals), target_params)
    assert out.shape == (B, OUTPUT_DIM)
    assert out.dtype == OUT_DTYPE
    assert jnp.allclose(out.astype(jnp.float32), ref, atol=5e-2, rtol=5e-2)

    print("KERNEL_OK")
</pallas_src>

<mosaic_0001>
module attributes {stable_mosaic.version = 11 : i64} {
  func.func @rnd_mlp_kernel(%arg0: i32, %arg1: memref<256x8xbf16, #tpu.memory_space<vmem>>, %arg2: memref<8x128xbf16, #tpu.memory_space<vmem>>, %arg3: memref<1x128xf32, #tpu.memory_space<vmem>>, %arg4: memref<128x128xbf16, #tpu.memory_space<vmem>>, %arg5: memref<1x128xf32, #tpu.memory_space<vmem>>, %arg6: memref<128x128xbf16, #tpu.memory_space<vmem>>, %arg7: memref<1x128xf32, #tpu.memory_space<vmem>>, %arg8: memref<128x512xbf16, #tpu.memory_space<vmem>>, %arg9: memref<1x512xf32, #tpu.memory_space<vmem>>, %arg10: memref<256x512xbf16, #tpu.memory_space<vmem>>) attributes {dimension_semantics = [#tpu.dimension_semantics<parallel>], iteration_bounds = array<i64: 1>, scalar_prefetch = 0 : i64, scratch_operands = 0 : i64, tpu.core_type = #tpu.core_type<tc>, window_params = [{transform_indices = @transform_0, window_bounds = array<i64: 256, 8>}, {pipeline_mode = #tpu.pipeline_mode<synchronous>, transform_indices = @transform_1, window_bounds = array<i64: 8, 128>}, {pipeline_mode = #tpu.pipeline_mode<synchronous>, transform_indices = @transform_2, window_bounds = array<i64: 1, 128>}, {pipeline_mode = #tpu.pipeline_mode<synchronous>, transform_indices = @transform_3, window_bounds = array<i64: 128, 128>}, {pipeline_mode = #tpu.pipeline_mode<synchronous>, transform_indices = @transform_4, window_bounds = array<i64: 1, 128>}, {pipeline_mode = #tpu.pipeline_mode<synchronous>, transform_indices = @transform_5, window_bounds = array<i64: 128, 128>}, {pipeline_mode = #tpu.pipeline_mode<synchronous>, transform_indices = @transform_6, window_bounds = array<i64: 1, 128>}, {pipeline_mode = #tpu.pipeline_mode<synchronous>, transform_indices = @transform_7, window_bounds = array<i64: 128, 512>}, {pipeline_mode = #tpu.pipeline_mode<synchronous>, transform_indices = @transform_8, window_bounds = array<i64: 1, 512>}, {transform_indices = @transform_9, window_bounds = array<i64: 256, 512>}]} {
    %c0 = arith.constant 0 : index
    %c0_0 = arith.constant 0 : index
    %0 = vector.load %arg1[%c0, %c0_0] : memref<256x8xbf16, #tpu.memory_space<vmem>>, vector<256x8xbf16>
    %c0_1 = arith.constant 0 : index
    %c0_2 = arith.constant 0 : index
    %1 = vector.load %arg2[%c0_1, %c0_2] : memref<8x128xbf16, #tpu.memory_space<vmem>>, vector<8x128xbf16>
    %cst = arith.constant dense<0.000000e+00> : vector<256x128xf32>
    %2 = tpu.matmul %0, %1, %cst {dimension_numbers = #tpu.dot_dimension_numbers<[1], [0], [0], [1], [0, 0, 1, 1], [], []>} : vector<256x8xbf16>, vector<8x128xbf16>, vector<256x128xf32> -> vector<256x128xf32>
    %c0_3 = arith.constant 0 : index
    %c0_4 = arith.constant 0 : index
    %3 = vector.load %arg3[%c0_3, %c0_4] : memref<1x128xf32, #tpu.memory_space<vmem>>, vector<1x128xf32>
    %4 = vector.broadcast %3 : vector<1x128xf32> to vector<256x128xf32>
    %5 = arith.addf %2, %4 : vector<256x128xf32>
    %cst_5 = arith.constant 0.000000e+00 : f32
    %6 = vector.broadcast %cst_5 : f32 to vector<256x128xf32>
    %7 = arith.maximumf %5, %6 : vector<256x128xf32>
    %8 = arith.truncf %7 : vector<256x128xf32> to vector<256x128xbf16>
    %c0_6 = arith.constant 0 : index
    %c0_7 = arith.constant 0 : index
    %9 = vector.load %arg4[%c0_6, %c0_7] : memref<128x128xbf16, #tpu.memory_space<vmem>>, vector<128x128xbf16>
    %cst_8 = arith.constant dense<0.000000e+00> : vector<256x128xf32>
    %10 = tpu.matmul %8, %9, %cst_8 {dimension_numbers = #tpu.dot_dimension_numbers<[1], [0], [0], [1], [0, 0, 1, 1], [], []>} : vector<256x128xbf16>, vector<128x128xbf16>, vector<256x128xf32> -> vector<256x128xf32>
    %c0_9 = arith.constant 0 : index
    %c0_10 = arith.constant 0 : index
    %11 = vector.load %arg5[%c0_9, %c0_10] : memref<1x128xf32, #tpu.memory_space<vmem>>, vector<1x128xf32>
    %12 = vector.broadcast %11 : vector<1x128xf32> to vector<256x128xf32>
    %13 = arith.addf %10, %12 : vector<256x128xf32>
    %cst_11 = arith.constant 0.000000e+00 : f32
    %14 = vector.broadcast %cst_11 : f32 to vector<256x128xf32>
    %15 = arith.maximumf %13, %14 : vector<256x128xf32>
    %16 = arith.truncf %15 : vector<256x128xf32> to vector<256x128xbf16>
    %c0_12 = arith.constant 0 : index
    %c0_13 = arith.constant 0 : index
    %17 = vector.load %arg6[%c0_12, %c0_13] : memref<128x128xbf16, #tpu.memory_space<vmem>>, vector<128x128xbf16>
    %cst_14 = arith.constant dense<0.000000e+00> : vector<256x128xf32>
    %18 = tpu.matmul %16, %17, %cst_14 {dimension_numbers = #tpu.dot_dimension_numbers<[1], [0], [0], [1], [0, 0, 1, 1], [], []>} : vector<256x128xbf16>, vector<128x128xbf16>, vector<256x128xf32> -> vector<256x128xf32>
    %c0_15 = arith.constant 0 : index
    %c0_16 = arith.constant 0 : index
    %19 = vector.load %arg7[%c0_15, %c0_16] : memref<1x128xf32, #tpu.memory_space<vmem>>, vector<1x128xf32>
    %20 = vector.broadcast %19 : vector<1x128xf32> to vector<256x128xf32>
    %21 = arith.addf %18, %20 : vector<256x128xf32>
    %cst_17 = arith.constant 0.000000e+00 : f32
    %22 = vector.broadcast %cst_17 : f32 to vector<256x128xf32>
    %23 = arith.maximumf %21, %22 : vector<256x128xf32>
    %24 = arith.truncf %23 : vector<256x128xf32> to vector<256x128xbf16>
    %c0_18 = arith.constant 0 : index
    %c0_19 = arith.constant 0 : index
    %25 = vector.load %arg8[%c0_18, %c0_19] : memref<128x512xbf16, #tpu.memory_space<vmem>>, vector<128x512xbf16>
    %cst_20 = arith.constant dense<0.000000e+00> : vector<256x512xf32>
    %26 = tpu.matmul %24, %25, %cst_20 {dimension_numbers = #tpu.dot_dimension_numbers<[1], [0], [0], [1], [0, 0, 1, 1], [], []>} : vector<256x128xbf16>, vector<128x512xbf16>, vector<256x512xf32> -> vector<256x512xf32>
    %c0_21 = arith.constant 0 : index
    %c0_22 = arith.constant 0 : index
    %27 = vector.load %arg9[%c0_21, %c0_22] : memref<1x512xf32, #tpu.memory_space<vmem>>, vector<1x512xf32>
    %28 = vector.broadcast %27 : vector<1x512xf32> to vector<256x512xf32>
    %29 = arith.addf %26, %28 : vector<256x512xf32>
    %30 = arith.truncf %29 : vector<256x512xf32> to vector<256x512xbf16>
    %c0_23 = arith.constant 0 : index
    %c0_24 = arith.constant 0 : index
    %31 = vector.load %arg10[%c0_23, %c0_24] : memref<256x512xbf16, #tpu.memory_space<vmem>>, vector<256x512xbf16>
    tpu.vector_store %arg10[%c0_23, %c0_24], %30 {strides = array<i32>} : memref<256x512xbf16, #tpu.memory_space<vmem>>, vector<256x512xbf16>,
    return
  }
  func.func @transform_0(%arg0: i32) -> (i32, i32) {
    %c0_i32 = arith.constant 0 : i32
    %c0_i32_0 = arith.constant 0 : i32
    return %arg0, %c0_i32 : i32, i32
  }
  func.func @transform_1(%arg0: i32) -> (i32, i32) {
    %c0_i32 = arith.constant 0 : i32
    %c0_i32_0 = arith.constant 0 : i32
    %c0_i32_1 = arith.constant 0 : i32
    return %c0_i32, %c0_i32_0 : i32, i32
  }
  func.func @transform_2(%arg0: i32) -> (i32, i32) {
    %c0_i32 = arith.constant 0 : i32
    %c0_i32_0 = arith.constant 0 : i32
    %c0_i32_1 = arith.constant 0 : i32
    return %c0_i32, %c0_i32_0 : i32, i32
  }
  func.func @transform_3(%arg0: i32) -> (i32, i32) {
    %c0_i32 = arith.constant 0 : i32
    %c0_i32_0 = arith.constant 0 : i32
    %c0_i32_1 = arith.constant 0 : i32
    return %c0_i32, %c0_i32_0 : i32, i32
  }
  func.func @transform_4(%arg0: i32) -> (i32, i32) {
    %c0_i32 = arith.constant 0 : i32
    %c0_i32_0 = arith.constant 0 : i32
    %c0_i32_1 = arith.constant 0 : i32
    return %c0_i32, %c0_i32_0 : i32, i32
  }
  func.func @transform_5(%arg0: i32) -> (i32, i32) {
    %c0_i32 = arith.constant 0 : i32
    %c0_i32_0 = arith.constant 0 : i32
    %c0_i32_1 = arith.constant 0 : i32
    return %c0_i32, %c0_i32_0 : i32, i32
  }
  func.func @transform_6(%arg0: i32) -> (i32, i32) {
    %c0_i32 = arith.constant 0 : i32
    %c0_i32_0 = arith.constant 0 : i32
    %c0_i32_1 = arith.constant 0 : i32
    return %c0_i32, %c0_i32_0 : i32, i32
  }
  func.func @transform_7(%arg0: i32) -> (i32, i32) {
    %c0_i32 = arith.constant 0 : i32
    %c0_i32_0 = arith.constant 0 : i32
    %c0_i32_1 = arith.constant 0 : i32
    return %c0_i32, %c0_i32_0 : i32, i32
  }
  func.func @transform_8(%arg0: i32) -> (i32, i32) {
    %c0_i32 = arith.constant 0 : i32
    %c0_i32_0 = arith.constant 0 : i32
    %c0_i32_1 = arith.constant 0 : i32
    return %c0_i32, %c0_i32_0 : i32, i32
  }
  func.func @transform_9(%arg0: i32) -> (i32, i32) {
    %c0_i32 = arith.constant 0 : i32
    %c0_i32_0 = arith.constant 0 : i32
    return %arg0, %c0_i32 : i32, i32
  }
}

</mosaic_0001>

<bundles_post_ra>
// kernel: tpu_custom_call.1
= control target key start
LH: loop header
LB: loop body
LE: loop exit
PB: predicated region body
PF: predicated region fallthrough
CT: control target
= control target key end

     0   :  { %14 = vsyncpa [#allocation3], 0  ;;  %s3094_s0 = inlined_call_operand.vmem [shape: bf16[256,8], index: 0, kind: input, shape index: {}]   ;;  %s3095_s1 = inlined_call_operand.vmem [shape: bf16[8,128], index: 1, kind: input, shape index: {}]   ;;  %s3096_s2 = inlined_call_operand.vmem [shape: f32[1,128], index: 2, kind: input, shape index: {}]   ;;  %s3097_s3 = inlined_call_operand.vmem [shape: bf16[128,128], index: 3, kind: input, shape index: {}]   ;;  %s3098_s4 = inlined_call_operand.vmem [shape: f32[1,128], index: 4, kind: input, shape index: {}]   ;;  %s3099_s5 = inlined_call_operand.vmem [shape: bf16[128,128], index: 5, kind: input, shape index: {}]   ;;  %s3100_s6 = inlined_call_operand.vmem [shape: f32[1,128], index: 6, kind: input, shape index: {}]   ;;  %s3101_s7 = inlined_call_operand.hbm [shape: bf16[128,512], index: 7, kind: input, shape index: {}]   ;;  %s3102_s8 = inlined_call_operand.vmem [shape: f32[1,512], index: 8, kind: input, shape index: {}]   ;;  %s3103_s9 = inlined_call_operand.hbm [shape: bf16[256,512], index: 9, kind: output, shape index: {}]  }
   0x1   :  { %15 = vsyncpa [#allocation4], 0  ;;  %s2598_s30 = smov [#allocation2]   ;;  %s2550_s13 = scalar_lea.hbm %s3101_s7, 4096 }
   0x2   :  { %s35_s10 = sshll.u32 %s2598_s30, 4  ;;  %p2551_p0 = scmp.ne.s32.totalorder %s3101_s7, %s2550_s13  ;;  %s36_s10 = int_to_ptr.vmem [resolvable:$true] %s35_s10 }
   0x3   :  { %p2554_p1 = scmp.lt.u32.totalorder %s2550_s13, %s3101_s7 }
   0x5   :  { %p2556_p2 = pnand %p2554_p1, %p2551_p0 }
   0x7   :  { %2559 = shalt.err (!%p2556_p2)
}
   0x8   :  { %s2560_s18 = scalar_lea.vmem %s36_s10, 4096  ;;  %p2565_p4 = scmp.lt.s32.totalorder %s36_s10, %s36_s10 }
   0x9   :  { %p2561_p3 = scmp.ne.s32.totalorder %s36_s10, %s2560_s18  ;;  %p2566_p5 = scmp.lt.s32.totalorder %s2560_s18, %s2560_s18 }
   0xb   :  { %p2567_p6 = por %p2566_p5, %p2565_p4 }
   0xd   :  { %p2568_p7 = pnand %p2567_p6, %p2561_p3 }
   0xf   :  { %2571 = shalt.err (!%p2568_p7)
}
  0x10   :  { %s2599_s19 = smov 256   ;;  %s2600_s20 = smov 16  }
  0x11   :  { %41 = dma.hbm_to_vmem [thread:$0]  %s3101_s7, 4096, %s36_s10, [#allocation3], %s2599_s19, %s2599_s19, %s2600_s20  }
  0x12   :  { %2594 = dma.done.wait [#allocation3], 4096  }
  0x13   :  { %2595 = vsyncadd [#allocation3], 4294963200  ;;  %vm217_vm0 = vcmask 1043456   ;;  %vm168_vm1 = vcmask 64512   ;;  %v80_v0 = vld [vmem:[%s3095_s1] sm:$0xf] }
  0x14   :  { %2463 = vmatprep.subr.msk.bf16.mxu0 %vm217_vm0, %v80_v0  ;;  %v219_v1 = vsel %vm217_vm0, %v80_v0, 0  ;;  %v2470_v2 = vld [vmem:[%s3094_s0] sm:$0xff]   ;;  %2464 = vmatprep.subr.msk.bf16.mxu1 %vm217_vm0, %v80_v0  ;;  %v2471_v3 = vld [vmem:[%s3094_s0 + $0x8] sm:$0xff]   ;;  %v2472_v4 = vld [vmem:[%s3094_s0 + $0x10] sm:$0xff]  }
  0x15   :  { %2332 = vmatpush3.bf16.msra.mxu0 %v219_v1  ;;  %2462 = vmatpush3.bf16.msra.mxu1 %v219_v1  ;;  %v2473_v5 = vld [vmem:[%s3094_s0 + $0x18] sm:$0xff]   ;;  %v2474_v6 = vld [vmem:[%s3094_s0 + $0x20] sm:$0xff]   ;;  %v2479_v8 = vld [vmem:[%s3094_s0 + $0x48] sm:$0xff]  }
  0x16   :  { %2333 = vmatprep.mubr.msk.bf16.mxu0 %vm168_vm1, %v2470_v2  ;;  %v2478_v7 = vld [vmem:[%s3094_s0 + $0x40] sm:$0xff]   ;;  %v2480_v9 = vld [vmem:[%s3094_s0 + $0x50] sm:$0xff]   ;;  %v2475_v10 = vld [vmem:[%s3094_s0 + $0x28] sm:$0xff]  }
  0x17   :  { %2349 = vmatprep.mubr.msk.bf16.mxu1 %vm168_vm1, %v2478_v7  ;;  %v2481_v11 = vld [vmem:[%s3094_s0 + $0x58] sm:$0xff]   ;;  %v2482_v12 = vld [vmem:[%s3094_s0 + $0x60] sm:$0xff]   ;;  %v2476_v14 = vld [vmem:[%s3094_s0 + $0x30] sm:$0xff]  }
  0x18   :  { %2334 = vmatmul.mubr.msk.bf16.vlgmr.msra.gmra.mrb[0].mxu0 %vm168_vm1, %v2471_v3  ;;  %2350 = vmatmul.mubr.msk.bf16.vlgmr.msra.gmra.mrb[0].mxu1 %vm168_vm1, %v2479_v8  ;;  %v2486_v13 = vld [vmem:[%s3097_s3] sm:$0xff]   ;;  %v2487_v15 = vld [vmem:[%s3097_s3 + $0x8] sm:$0xff]   ;;  %v2488_v17 = vld [vmem:[%s3097_s3 + $0x10] sm:$0xff]  }
  0x19   :  { %2337 = vmatprep.mubr.msk.bf16.mxu0 %vm168_vm1, %v2472_v4  ;;  %2353 = vmatprep.mubr.msk.bf16.mxu1 %vm168_vm1, %v2480_v9  ;;  %v2483_v16 = vld [vmem:[%s3094_s0 + $0x68] sm:$0xff]   ;;  %v2477_v18 = vld [vmem:[%s3094_s0 + $0x38] sm:$0xff]   ;;  %v2484_v19 = vld [vmem:[%s3094_s0 + $0x70] sm:$0xff]  }
  0x1a   :  { %2365 = vmatprep.subr.bf16.mxu1 %v2486_v13  ;;  %v2489_v20 = vld [vmem:[%s3097_s3 + $0x18] sm:$0xff]   ;;  %v2490_v21 = vld [vmem:[%s3097_s3 + $0x20] sm:$0xff]   ;;  %v2491_v23 = vld [vmem:[%s3097_s3 + $0x28] sm:$0xff]  }
  0x1b   :  { %2366 = vmatpush3.bf16.msra.mxu1 %v2486_v13  ;;  %v2485_v22 = vld [vmem:[%s3094_s0 + $0x78] sm:$0xff]   ;;  %v2492_v24 = vld [vmem:[%s3097_s3 + $0x30] sm:$0xff]   ;;  %v2494_v26 = vld [vmem:[%s3099_s5] sm:$0xff]  }
  0x1c   :  { %2367 = vmatprep.subr.bf16.mxu1 %v2487_v15  ;;  %v2493_v25 = vld [vmem:[%s3097_s3 + $0x38] sm:$0xff]   ;;  %v2495_v27 = vld [vmem:[%s3099_s5 + $0x8] sm:$0xff]   ;;  %2413 = vmatprep.subr.bf16.mxu0 %v2494_v26  ;;  %v2496_v28 = vld [vmem:[%s3099_s5 + $0x10] sm:$0xff]  }
  0x1d   :  { %2414 = vmatpush3.bf16.msra.mxu0 %v2494_v26  ;;  %v2497_v29 = vld [vmem:[%s3099_s5 + $0x18] sm:$0xff]   ;;  %v2498_v30 = vld [vmem:[%s3099_s5 + $0x20] sm:$0xff]   ;;  %v2499_v31 = vld [vmem:[%s3099_s5 + $0x28] sm:$0xff]  }
  0x1e   :  { %2415 = vmatprep.subr.bf16.mxu0 %v2495_v27  ;;  %v2780_v32 = vld [vmem:[%s3096_s2] ss:$0 sm:$0xff] }
  0x1f   :  { %2368 = vmatpush3.bf16.msra.mxu1 %v2487_v15 }
  0x20   :  { %2338 = vmatmul.mubr.msk.bf16.gmra.mrb[4].mxu0 %vm168_vm1, %v2473_v5  ;;  %2354 = vmatmul.mubr.msk.bf16.gmra.mrb[4].mxu1 %vm168_vm1, %v2481_v11 }
  0x21   :  { %2341 = vmatprep.mubr.msk.bf16.mxu0 %vm168_vm1, %v2474_v6  ;;  %2357 = vmatprep.mubr.msk.bf16.mxu1 %vm168_vm1, %v2482_v12 }
  0x22   :  { %2369 = vmatprep.subr.bf16.mxu1 %v2488_v17  ;;  %2416 = vmatpush3.bf16.msra.mxu0 %v2495_v27 }
  0x23   :  { %2370 = vmatpush3.bf16.msra.mxu1 %v2488_v17  ;;  %2417 = vmatprep.subr.bf16.mxu0 %v2496_v28 }
  0x24   :  { %2371 = vmatprep.subr.bf16.mxu1 %v2489_v20 }
  0x26   :  { %2418 = vmatpush3.bf16.msra.mxu0 %v2496_v28 }
  0x27   :  { %2372 = vmatpush3.bf16.msra.mxu1 %v2489_v20  ;;  %2419 = vmatprep.subr.bf16.mxu0 %v2497_v29 }
  0x28   :  { %2342 = vmatmul.mubr.msk.bf16.gmra.mrb[8].mxu0 %vm168_vm1, %v2475_v10  ;;  %2358 = vmatmul.mubr.msk.bf16.gmra.mrb[8].mxu1 %vm168_vm1, %v2483_v16 }
  0x29   :  { %2345 = vmatprep.mubr.msk.bf16.mxu0 %vm168_vm1, %v2476_v14  ;;  %2361 = vmatprep.mubr.msk.bf16.mxu1 %vm168_vm1, %v2484_v19 }
  0x2a   :  { %2373 = vmatprep.subr.bf16.mxu1 %v2490_v21  ;;  %2420 = vmatpush3.bf16.msra.mxu0 %v2497_v29 }
  0x2b   :  { %2374 = vmatpush3.bf16.msra.mxu1 %v2490_v21  ;;  %2421 = vmatprep.subr.bf16.mxu0 %v2498_v30 }
  0x2c   :  { %2375 = vmatprep.subr.bf16.mxu1 %v2491_v23 }
  0x2e   :  { %2422 = vmatpush3.bf16.msra.mxu0 %v2498_v30 }
  0x2f   :  { %2376 = vmatpush3.bf16.msra.mxu1 %v2491_v23  ;;  %2423 = vmatprep.subr.bf16.mxu0 %v2499_v31 }
  0x30   :  { %2346 = vmatmul.mubr.msk.bf16.gmra.mrb[12].mxu0 %vm168_vm1, %v2477_v18  ;;  %2362 = vmatmul.mubr.msk.bf16.gmra.mrb[12].mxu1 %vm168_vm1, %v2485_v22 }
  0x31   :  { %2377 = vmatprep.subr.bf16.mxu1 %v2492_v24 }
  0x32   :  { %2424 = vmatpush3.bf16.msra.mxu0 %v2499_v31 }
  0x33   :  { %2378 = vmatpush3.bf16.msra.mxu1 %v2492_v24 }
  0x34   :  { %2379 = vmatprep.subr.bf16.mxu1 %v2493_v25 }
  0x37   :  { %2380 = vmatpush3.bf16.msra.mxu1 %v2493_v25 }
  0xeb   :  { %v2335_v33 = vpop.f32.mrb[0].mxu0  ;;  %v2351_v46 = vpop.f32.mrb[0].mxu1 }
  0xec   :  { %v264_v34 = vadd.f32 %v2335_v33, %v2780_v32  ;;  %v255_v35 = vpop.f32.mrb[1].mxu0  ;;  %v328_v49 = vadd.f32 %v2351_v46, %v2780_v32  ;;  %v319_v50 = vpop.f32.mrb[1].mxu1 }
  0xed   :  { %v256_v36 = vadd.f32 %v2780_v32, %v255_v35  ;;  %v2336_v37 = vpop.f32.mrb[2].mxu0  ;;  %v320_v53 = vadd.f32 %v2780_v32, %v319_v50  ;;  %v2352_v54 = vpop.f32.mrb[2].mxu1 }
  0xee   :  { %v267_v38 = vadd.f32 %v2336_v37, %v2780_v32  ;;  %v258_v39 = vpop.f32.mrb[3].mxu0  ;;  %v384_v41 = vmax.f32 %v264_v34, 0.0  ;;  %v400_v57 = vmax.f32 %v328_v49, 0.0  ;;  %v331_v58 = vadd.f32 %v2352_v54, %v2780_v32  ;;  %v322_v59 = vpop.f32.mrb[3].mxu1 }
  0xef   :  { %v259_v40 = vadd.f32 %v2780_v32, %v258_v39  ;;  %v382_v43 = vmax.f32 %v256_v36, 0.0  ;;  %v398_v63 = vmax.f32 %v320_v53, 0.0  ;;  %v323_v0 = vadd.f32 %v2780_v32, %v322_v59 }
  0xf0   :  { %v385_v42 = vmax.f32 %v267_v38, 0.0  ;;  %v401_v3 = vmax.f32 %v331_v58, 0.0 }
  0xf1   :  { %v383_v44 = vmax.f32 %v259_v40, 0.0  ;;  %v399_v5 = vmax.f32 %v323_v0, 0.0 }
  0xf2   :  { %v415_v45 = vpack.c.bf16 %v385_v42, %v384_v41  ;;  %v2794_v7 = vpack.c.bf16 %v401_v3, %v400_v57 }
  0xf3   :  { %v414_v47 = vpack.c.bf16 %v383_v44, %v382_v43  ;;  %v2339_v48 = vpop.f32.mrb[4].mxu0  ;;  %v2796_v9 = vpack.c.bf16 %v399_v5, %v398_v63  ;;  %v2355_v10 = vpop.f32.mrb[4].mxu1 }
  0xf4   :  { %v280_v51 = vadd.f32 %v2339_v48, %v2780_v32  ;;  %v271_v52 = vpop.f32.mrb[5].mxu0  ;;  %v344_v13 = vadd.f32 %v2355_v10, %v2780_v32  ;;  %v335_v14 = vpop.f32.mrb[5].mxu1 }
  0xf5   :  { %v272_v55 = vadd.f32 %v2780_v32, %v271_v52  ;;  %v2340_v56 = vpop.f32.mrb[6].mxu0  ;;  %2381 = vmatprep.mubr.bf16.mxu1 %v414_v47  ;;  %v336_v17 = vadd.f32 %v2780_v32, %v335_v14  ;;  %v2356_v18 = vpop.f32.mrb[6].mxu1 }
  0xf6   :  { %v388_v60 = vmax.f32 %v280_v51, 0.0  ;;  %v283_v61 = vadd.f32 %v2340_v56, %v2780_v32  ;;  %v274_v62 = vpop.f32.mrb[7].mxu0  ;;  %2382 = vmatmul.mubr.bf16.vlgmr.msra.gmra.mrb[16].mxu1 %v415_v45  ;;  %v404_v21 = vmax.f32 %v344_v13, 0.0  ;;  %v347_v22 = vadd.f32 %v2356_v18, %v2780_v32  ;;  %v338_v23 = vpop.f32.mrb[7].mxu1 }
  0xf7   :  { %v386_v1 = vmax.f32 %v272_v55, 0.0  ;;  %v275_v2 = vadd.f32 %v2780_v32, %v274_v62  ;;  %v402_v27 = vmax.f32 %v336_v17, 0.0  ;;  %v339_v28 = vadd.f32 %v2780_v32, %v338_v23  ;;  %v2508_v23 = vld [vmem:[#allocation2 + $0x20] ss:$16 sps:$4 sm:$0xff]  }
  0xf8   :  { %v389_v4 = vmax.f32 %v283_v61, 0.0  ;;  %v405_v31 = vmax.f32 %v347_v22, 0.0  ;;  %v2510_v22 = vld [vmem:[#allocation2 + $0x24] ss:$16 sps:$4 sm:$0xff]  }
  0xf9   :  { %v387_v6 = vmax.f32 %v275_v2, 0.0  ;;  %v403_v34 = vmax.f32 %v339_v28, 0.0  ;;  %v2528_v28 = vld [vmem:[#allocation2 + $0x84] ss:$16 sps:$4 sm:$0xff]  }
  0xfa   :  { %v417_v8 = vpack.c.bf16 %v389_v4, %v388_v60  ;;  %v425_v36 = vpack.c.bf16 %v405_v31, %v404_v21  ;;  %v2507_v21 = vld [vmem:[#allocation2 + $0xc] ss:$16 sps:$4 sm:$0xff]   ;;  %v2532_v31 = vld [vmem:[#allocation2 + $0xa0] ss:$16 sps:$4 sm:$0xff]  }
  0xfb   :  { %v416_v11 = vpack.c.bf16 %v387_v6, %v386_v1  ;;  %v2343_v12 = vpop.f32.mrb[8].mxu0  ;;  %v424_v38 = vpack.c.bf16 %v403_v34, %v402_v27  ;;  %v2359_v39 = vpop.f32.mrb[8].mxu1  ;;  %v2520_v27 = vld [vmem:[#allocation2 + $0x60] ss:$16 sps:$4 sm:$0xff]  }
  0xfc   :  { %v296_v15 = vadd.f32 %v2343_v12, %v2780_v32  ;;  %v287_v16 = vpop.f32.mrb[9].mxu0  ;;  %v360_v42 = vadd.f32 %v2359_v39, %v2780_v32  ;;  %v351_v43 = vpop.f32.mrb[9].mxu1  ;;  %v2538_v34 = vld [vmem:[#allocation2 + $0xc0] ss:$16 sps:$4 sm:$0xff]  }
  0xfd   :  { %2385 = vmatprep.mubr.bf16.mxu1 %v416_v11  ;;  %v288_v19 = vadd.f32 %v2780_v32, %v287_v16  ;;  %v2344_v20 = vpop.f32.mrb[10].mxu0  ;;  %v352_v46 = vadd.f32 %v2780_v32, %v351_v43  ;;  %v2360_v47 = vpop.f32.mrb[10].mxu1 }
  0xfe   :  { %2386 = vmatmul.mubr.bf16.gmra.mrb[20].mxu1 %v417_v8  ;;  %v392_v24 = vmax.f32 %v296_v15, 0.0  ;;  %v299_v25 = vadd.f32 %v2344_v20, %v2780_v32  ;;  %v290_v26 = vpop.f32.mrb[11].mxu0  ;;  %v408_v50 = vmax.f32 %v360_v42, 0.0  ;;  %v363_v51 = vadd.f32 %v2360_v47, %v2780_v32  ;;  %v354_v52 = vpop.f32.mrb[11].mxu1  ;;  %v2500_v20 = vld [vmem:[%s3099_s5 + $0x30] sm:$0xff]  }
  0xff   :  { %v390_v29 = vmax.f32 %v288_v19, 0.0  ;;  %v291_v30 = vadd.f32 %v2780_v32, %v290_v26  ;;  %v406_v56 = vmax.f32 %v352_v46, 0.0  ;;  %v355_v57 = vadd.f32 %v2780_v32, %v354_v52  ;;  %2425 = vmatprep.subr.bf16.mxu0 %v2500_v20  ;;  %v2522_v26 = vld [vmem:[#allocation2 + $0x64] ss:$16 sps:$4 sm:$0xff]  }
 0x100   :  { %v393_v33 = vmax.f32 %v299_v25, 0.0  ;;  %v409_v60 = vmax.f32 %v363_v51, 0.0  ;;  %2426 = vmatpush3.bf16.msra.mxu0 %v2500_v20  ;;  %v2514_v25 = vld [vmem:[#allocation2 + $0x40] ss:$16 sps:$4 sm:$0xff]   ;;  %v2505_v51 = vld [vmem:[#allocation2 + $0x8] ss:$16 sps:$4 sm:$0xff]  }
 0x101   :  { %v391_v35 = vmax.f32 %v291_v30, 0.0  ;;  %v407_v62 = vmax.f32 %v355_v57, 0.0  ;;  %v2534_v30 = vld [vmem:[#allocation2 + $0xa4] ss:$16 sps:$4 sm:$0xff]   ;;  %v2531_v20 = vld [vmem:[#allocation2 + $0x8c] ss:$16 sps:$4 sm:$0xff]  }
 0x102   :  { %v419_v37 = vpack.c.bf16 %v393_v33, %v392_v24  ;;  %v427_v0 = vpack.c.bf16 %v409_v60, %v408_v50  ;;  %v2516_v24 = vld [vmem:[#allocation2 + $0x44] ss:$16 sps:$4 sm:$0xff]  }
 0x103   :  { %v418_v40 = vpack.c.bf16 %v391_v35, %v390_v29  ;;  %v2347_v41 = vpop.f32.mrb[12].mxu0  ;;  %v426_v2 = vpack.c.bf16 %v407_v62, %v406_v56  ;;  %v2363_v3 = vpop.f32.mrb[12].mxu1  ;;  %v2526_v29 = vld [vmem:[#allocation2 + $0x80] ss:$16 sps:$4 sm:$0xff]   ;;  %v2540_v33 = vld [vmem:[#allocation2 + $0xc4] ss:$16 sps:$4 sm:$0xff]  }
 0x104   :  { %v312_v44 = vadd.f32 %v2347_v41, %v2780_v32  ;;  %v303_v45 = vpop.f32.mrb[13].mxu0  ;;  %v376_v5 = vadd.f32 %v2363_v3, %v2780_v32  ;;  %v367_v6 = vpop.f32.mrb[13].mxu1  ;;  %v2829_v35 = vld [vmem:[%s3098_s4] ss:$0 sm:$0xff]  ;;  %v2511_v62 = vld [vmem:[#allocation2 + $0x28] ss:$16 sps:$4 sm:$0xff]  }
 0x105   :  { %2389 = vmatprep.mubr.bf16.mxu1 %v418_v40  ;;  %v304_v48 = vadd.f32 %v2780_v32, %v303_v45  ;;  %v2348_v49 = vpop.f32.mrb[14].mxu0  ;;  %v368_v8 = vadd.f32 %v2780_v32, %v367_v6  ;;  %v2364_v10 = vpop.f32.mrb[14].mxu1 }
 0x106   :  { %2390 = vmatmul.mubr.bf16.gmra.mrb[24].mxu1 %v419_v37  ;;  %v396_v53 = vmax.f32 %v312_v44, 0.0  ;;  %v315_v54 = vadd.f32 %v2348_v49, %v2780_v32  ;;  %v306_v55 = vpop.f32.mrb[15].mxu0  ;;  %v412_v11 = vmax.f32 %v376_v5, 0.0  ;;  %v379_v12 = vadd.f32 %v2364_v10, %v2780_v32  ;;  %v370_v13 = vpop.f32.mrb[15].mxu1  ;;  %v2517_v5 = vld [vmem:[#allocation2 + $0x48] ss:$16 sps:$4 sm:$0xff]  }
 0x107   :  { %v394_v58 = vmax.f32 %v304_v48, 0.0  ;;  %v307_v59 = vadd.f32 %v2780_v32, %v306_v55  ;;  %v410_v14 = vmax.f32 %v368_v8, 0.0  ;;  %v371_v15 = vadd.f32 %v2780_v32, %v370_v13  ;;  %v2501_v32 = vld [vmem:[%s3099_s5 + $0x38] sm:$0xff]  }
 0x108   :  { %v397_v61 = vmax.f32 %v315_v54, 0.0  ;;  %v413_v16 = vmax.f32 %v379_v12, 0.0  ;;  %2427 = vmatprep.subr.bf16.mxu0 %v2501_v32  ;;  %v2513_v54 = vld [vmem:[#allocation2 + $0x2c] ss:$16 sps:$4 sm:$0xff]  }
 0x109   :  { %v395_v63 = vmax.f32 %v307_v59, 0.0  ;;  %v411_v17 = vmax.f32 %v371_v15, 0.0  ;;  %2428 = vmatpush3.bf16.msra.mxu0 %v2501_v32  ;;  %v2525_v10 = vld [vmem:[#allocation2 + $0x6c] ss:$16 sps:$4 sm:$0xff]  }
 0x10a   :  { %v421_v1 = vpack.c.bf16 %v397_v61, %v396_v53  ;;  %v429_v18 = vpack.c.bf16 %v413_v16, %v412_v11  ;;  %1397 = vmatprep.subr.bf16.mxu0 %v2507_v21 }
 0x10b   :  { %v420_v4 = vpack.c.bf16 %v395_v63, %v394_v58  ;;  %v428_v19 = vpack.c.bf16 %v411_v17, %v410_v14 }
 0x10d   :  { %2393 = vmatprep.mubr.bf16.mxu1 %v420_v4 }
 0x10e   :  { %2394 = vmatmul.mubr.bf16.gmra.mrb[28].mxu1 %v421_v1 }
 0x10f   :  { %2397 = vmatprep.mubr.bf16.mxu1 %v2796_v9  ;;  %v2502_v9 = vld [vmem:[#allocation2] ss:$16 sps:$4 sm:$0xff]  }
 0x116   :  { %2398 = vmatmul.mubr.bf16.gmra.mrb[32].mxu1 %v2794_v7  ;;  %v2504_v7 = vld [vmem:[#allocation2 + $0x4] ss:$16 sps:$4 sm:$0xff]  }
 0x117   :  { %2401 = vmatprep.mubr.bf16.mxu1 %v424_v38  ;;  %1204 = vmatprep.subr.bf16.mxu1 %v2504_v7 }
 0x118   :  { %1205 = vmatpush1.bf16.msra.mxu1 %v2502_v9 }
 0x119   :  { %1206 = vmatprep.subr.bf16.mxu1 %v2510_v22  ;;  %v2529_v22 = vld [vmem:[#allocation2 + $0x88] ss:$16 sps:$4 sm:$0xff]  }
 0x11c   :  { %1207 = vmatpush1.bf16.msra.mxu1 %v2508_v23 }
 0x11d   :  { %1208 = vmatprep.subr.bf16.mxu1 %v2516_v24 }
 0x11e   :  { %2402 = vmatmul.mubr.bf16.gmra.mrb[36].mxu1 %v425_v36 }
 0x11f   :  { %2405 = vmatprep.mubr.bf16.mxu1 %v426_v2 }
 0x120   :  { %1209 = vmatpush1.bf16.msra.mxu1 %v2514_v25  ;;  %v2537_v25 = vld [vmem:[#allocation2 + $0xac] ss:$16 sps:$4 sm:$0xff]  }
 0x121   :  { %1210 = vmatprep.subr.bf16.mxu1 %v2522_v26 }
 0x124   :  { %1211 = vmatpush1.bf16.msra.mxu1 %v2520_v27 }
 0x125   :  { %1212 = vmatprep.subr.bf16.mxu1 %v2528_v28 }
 0x126   :  { %2406 = vmatmul.mubr.bf16.gmra.mrb[40].mxu1 %v427_v0  ;;  %v2519_v0 = vld [vmem:[#allocation2 + $0x4c] ss:$16 sps:$4 sm:$0xff]  }
 0x127   :  { %2409 = vmatprep.mubr.bf16.mxu1 %v428_v19 }
 0x128   :  { %1213 = vmatpush1.bf16.msra.mxu1 %v2526_v29 }
 0x129   :  { %1214 = vmatprep.subr.bf16.mxu1 %v2534_v30 }
 0x12c   :  { %1215 = vmatpush1.bf16.msra.mxu1 %v2532_v31 }
 0x12d   :  { %1216 = vmatprep.subr.bf16.mxu1 %v2540_v33 }
 0x12e   :  { %2410 = vmatmul.mubr.bf16.gmra.mrb[44].mxu1 %v429_v18  ;;  %v2523_v18 = vld [vmem:[#allocation2 + $0x68] ss:$16 sps:$4 sm:$0xff]  }
 0x130   :  { %1217 = vmatpush1.bf16.msra.mxu1 %v2538_v34  ;;  %v2535_v34 = vld [vmem:[#allocation2 + $0xa8] ss:$16 sps:$4 sm:$0xff]  }
 0x1c9   :  { %v2383_v36 = vpop.f32.mrb[16].mxu1 }
 0x1ca   :  { %v544_v37 = vadd.f32 %v2383_v36, %v2829_v35  ;;  %v535_v38 = vpop.f32.mrb[17].mxu1 }
 0x1cb   :  { %v536_v39 = vadd.f32 %v2829_v35, %v535_v38  ;;  %v2384_v40 = vpop.f32.mrb[18].mxu1 }
 0x1cc   :  { %v547_v41 = vadd.f32 %v2384_v40, %v2829_v35  ;;  %v538_v42 = vpop.f32.mrb[19].mxu1  ;;  %v664_v44 = vmax.f32 %v544_v37, 0.0  ;;  %v2543_v37 = vld [vmem:[#allocation2 + $0xcc] ss:$16 sps:$4 sm:$0xff]  }
 0x1cd   :  { %v539_v43 = vadd.f32 %v2829_v35, %v538_v42  ;;  %v662_v46 = vmax.f32 %v536_v39, 0.0  ;;  %v2541_v42 = vld [vmem:[#allocation2 + $0xc8] ss:$16 sps:$4 sm:$0xff]  }
 0x1ce   :  { %v665_v45 = vmax.f32 %v547_v41, 0.0 }
 0x1cf   :  { %v663_v47 = vmax.f32 %v539_v43, 0.0 }
 0x1d0   :  { %v695_v48 = vpack.c.bf16 %v665_v45, %v664_v44 }
 0x1d1   :  { %v694_v49 = vpack.c.bf16 %v663_v47, %v662_v46  ;;  %v2387_v50 = vpop.f32.mrb[20].mxu1 }
 0x1d2   :  { %v560_v52 = vadd.f32 %v2387_v50, %v2829_v35  ;;  %v551_v53 = vpop.f32.mrb[21].mxu1 }
 0x1d3   :  { %v552_v55 = vadd.f32 %v2829_v35, %v551_v53  ;;  %v2388_v56 = vpop.f32.mrb[22].mxu1  ;;  %2429 = vmatprep.mubr.bf16.mxu0 %v694_v49 }
 0x1d4   :  { %v668_v57 = vmax.f32 %v560_v52, 0.0  ;;  %v563_v58 = vadd.f32 %v2388_v56, %v2829_v35  ;;  %v554_v59 = vpop.f32.mrb[23].mxu1  ;;  %2430 = vmatmul.mubr.bf16.vlgmr.msra.gmra.mrb[16].mxu0 %v695_v48 }
 0x1d5   :  { %v666_v60 = vmax.f32 %v552_v55, 0.0  ;;  %v555_v61 = vadd.f32 %v2829_v35, %v554_v59  ;;  %1398 = vmatpush1.bf16.msra.mxu0 %v2505_v51 }
 0x1d6   :  { %v669_v63 = vmax.f32 %v563_v58, 0.0  ;;  %1399 = vmatprep.subr.bf16.mxu0 %v2513_v54 }
 0x1d7   :  { %v667_v1 = vmax.f32 %v555_v61, 0.0 }
 0x1d8   :  { %v697_v2 = vpack.c.bf16 %v669_v63, %v668_v57 }
 0x1d9   :  { %v696_v3 = vpack.c.bf16 %v667_v1, %v666_v60  ;;  %v2391_v4 = vpop.f32.mrb[24].mxu1  ;;  %1400 = vmatpush1.bf16.msra.mxu0 %v2511_v62 }
 0x1da   :  { %v576_v6 = vadd.f32 %v2391_v4, %v2829_v35  ;;  %v567_v8 = vpop.f32.mrb[25].mxu1  ;;  %1401 = vmatprep.subr.bf16.mxu0 %v2519_v0 }
 0x1db   :  { %2433 = vmatprep.mubr.bf16.mxu0 %v696_v3  ;;  %v568_v11 = vadd.f32 %v2829_v35, %v567_v8  ;;  %v2392_v12 = vpop.f32.mrb[26].mxu1 }
 0x1dc   :  { %2434 = vmatmul.mubr.bf16.gmra.mrb[20].mxu0 %v697_v2  ;;  %v672_v13 = vmax.f32 %v576_v6, 0.0  ;;  %v579_v14 = vadd.f32 %v2392_v12, %v2829_v35  ;;  %v570_v15 = vpop.f32.mrb[27].mxu1 }
 0x1dd   :  { %v670_v16 = vmax.f32 %v568_v11, 0.0  ;;  %v571_v17 = vadd.f32 %v2829_v35, %v570_v15  ;;  %1402 = vmatpush1.bf16.msra.mxu0 %v2517_v5 }
 0x1de   :  { %v673_v19 = vmax.f32 %v579_v14, 0.0  ;;  %1403 = vmatprep.subr.bf16.mxu0 %v2525_v10 }
 0x1df   :  { %v671_v32 = vmax.f32 %v571_v17, 0.0 }
 0x1e0   :  { %v699_v9 = vpack.c.bf16 %v673_v19, %v672_v13 }
 0x1e1   :  { %v698_v7 = vpack.c.bf16 %v671_v32, %v670_v16  ;;  %v2395_v21 = vpop.f32.mrb[28].mxu1  ;;  %1404 = vmatpush1.bf16.msra.mxu0 %v2523_v18 }
 0x1e2   :  { %v592_v23 = vadd.f32 %v2395_v21, %v2829_v35  ;;  %v583_v24 = vpop.f32.mrb[29].mxu1  ;;  %1405 = vmatprep.subr.bf16.mxu0 %v2531_v20 }
 0x1e3   :  { %2437 = vmatprep.mubr.bf16.mxu0 %v698_v7  ;;  %v584_v26 = vadd.f32 %v2829_v35, %v583_v24  ;;  %v2396_v27 = vpop.f32.mrb[30].mxu1 }
 0x1e4   :  { %2438 = vmatmul.mubr.bf16.gmra.mrb[24].mxu0 %v699_v9  ;;  %v676_v28 = vmax.f32 %v592_v23, 0.0  ;;  %v595_v29 = vadd.f32 %v2396_v27, %v2829_v35  ;;  %v586_v30 = vpop.f32.mrb[31].mxu1 }
 0x1e5   :  { %v674_v31 = vmax.f32 %v584_v26, 0.0  ;;  %v587_v33 = vadd.f32 %v2829_v35, %v586_v30  ;;  %1406 = vmatpush1.bf16.msra.mxu0 %v2529_v22 }
 0x1e6   :  { %v677_v36 = vmax.f32 %v595_v29, 0.0  ;;  %1407 = vmatprep.subr.bf16.mxu0 %v2537_v25 }
 0x1e7   :  { %v675_v38 = vmax.f32 %v587_v33, 0.0 }
 0x1e8   :  { %v701_v39 = vpack.c.bf16 %v677_v36, %v676_v28  ;;  %v2546_v36 = vld [vmem:[#allocation2 + $0xe4] ss:$16 sps:$4 sm:$0xff]  }
 0x1e9   :  { %v700_v40 = vpack.c.bf16 %v675_v38, %v674_v31  ;;  %v2399_v41 = vpop.f32.mrb[32].mxu1  ;;  %1408 = vmatpush1.bf16.msra.mxu0 %v2535_v34  ;;  %v2544_v34 = vld [vmem:[#allocation2 + $0xe0] ss:$16 sps:$4 sm:$0xff]   ;;  %v2549_v38 = vld [vmem:[#allocation2 + $0xec] ss:$16 sps:$4 sm:$0xff]   ;;  %1218 = vmatprep.subr.bf16.mxu1 %v2546_v36 }
 0x1ea   :  { %v608_v43 = vadd.f32 %v2399_v41, %v2829_v35  ;;  %v599_v44 = vpop.f32.mrb[33].mxu1  ;;  %1409 = vmatprep.subr.bf16.mxu0 %v2543_v37  ;;  %v2547_v37 = vld [vmem:[#allocation2 + $0xe8] ss:$16 sps:$4 sm:$0xff]   ;;  %1219 = vmatpush1.bf16.msra.mxu1 %v2544_v34 }
 0x1eb   :  { %2441 = vmatprep.mubr.bf16.mxu0 %v700_v40  ;;  %v600_v45 = vadd.f32 %v2829_v35, %v599_v44  ;;  %v2400_v46 = vpop.f32.mrb[34].mxu1 }
 0x1ec   :  { %2442 = vmatmul.mubr.bf16.gmra.mrb[28].mxu0 %v701_v39  ;;  %v680_v47 = vmax.f32 %v608_v43, 0.0  ;;  %v611_v48 = vadd.f32 %v2400_v46, %v2829_v35  ;;  %v602_v49 = vpop.f32.mrb[35].mxu1  ;;  %v2601_v39 = vmov 0  }
 0x1ed   :  { %v678_v50 = vmax.f32 %v600_v45, 0.0  ;;  %v603_v51 = vadd.f32 %v2829_v35, %v602_v49  ;;  %1410 = vmatpush1.bf16.msra.mxu0 %v2541_v42  ;;  %1236 = vmatprep.mubr.bf16.mxu1 %v2601_v39 }
 0x1ee   :  { %v681_v52 = vmax.f32 %v611_v48, 0.0  ;;  %1411 = vmatprep.subr.bf16.mxu0 %v2549_v38 }
 0x1ef   :  { %v679_v53 = vmax.f32 %v603_v51, 0.0 }
 0x1f0   :  { %v703_v54 = vpack.c.bf16 %v681_v52, %v680_v47 }
 0x1f1   :  { %v702_v55 = vpack.c.bf16 %v679_v53, %v678_v50  ;;  %v2403_v56 = vpop.f32.mrb[36].mxu1  ;;  %1412 = vmatpush1.bf16.msra.mxu0 %v2547_v37 }
 0x1f2   :  { %v624_v57 = vadd.f32 %v2403_v56, %v2829_v35  ;;  %v615_v58 = vpop.f32.mrb[37].mxu1 }
 0x1f3   :  { %2445 = vmatprep.mubr.bf16.mxu0 %v702_v55  ;;  %v616_v59 = vadd.f32 %v2829_v35, %v615_v58  ;;  %v2404_v60 = vpop.f32.mrb[38].mxu1 }
 0x1f4   :  { %2446 = vmatmul.mubr.bf16.gmra.mrb[32].mxu0 %v703_v54  ;;  %v684_v61 = vmax.f32 %v624_v57, 0.0  ;;  %v627_v62 = vadd.f32 %v2404_v60, %v2829_v35  ;;  %v618_v63 = vpop.f32.mrb[39].mxu1 }
 0x1f5   :  { %v682_v0 = vmax.f32 %v616_v59, 0.0  ;;  %v619_v1 = vadd.f32 %v2829_v35, %v618_v63 }
 0x1f6   :  { %v685_v2 = vmax.f32 %v627_v62, 0.0 }
 0x1f7   :  { %v683_v3 = vmax.f32 %v619_v1, 0.0 }
 0x1f8   :  { %v705_v4 = vpack.c.bf16 %v685_v2, %v684_v61 }
 0x1f9   :  { %v704_v5 = vpack.c.bf16 %v683_v3, %v682_v0  ;;  %v2407_v6 = vpop.f32.mrb[40].mxu1 }
 0x1fa   :  { %v640_v8 = vadd.f32 %v2407_v6, %v2829_v35  ;;  %v631_v10 = vpop.f32.mrb[41].mxu1 }
 0x1fb   :  { %2449 = vmatprep.mubr.bf16.mxu0 %v704_v5  ;;  %v632_v11 = vadd.f32 %v2829_v35, %v631_v10  ;;  %v2408_v12 = vpop.f32.mrb[42].mxu1 }
 0x1fc   :  { %2450 = vmatmul.mubr.bf16.gmra.mrb[36].mxu0 %v705_v4  ;;  %v688_v13 = vmax.f32 %v640_v8, 0.0  ;;  %v643_v14 = vadd.f32 %v2408_v12, %v2829_v35  ;;  %v634_v15 = vpop.f32.mrb[43].mxu1 }
 0x1fd   :  { %v686_v16 = vmax.f32 %v632_v11, 0.0  ;;  %v635_v17 = vadd.f32 %v2829_v35, %v634_v15 }
 0x1fe   :  { %v689_v18 = vmax.f32 %v643_v14, 0.0 }
 0x1ff   :  { %v687_v19 = vmax.f32 %v635_v17, 0.0 }
 0x200   :  { %v707_v20 = vpack.c.bf16 %v689_v18, %v688_v13 }
 0x201   :  { %v706_v32 = vpack.c.bf16 %v687_v19, %v686_v16  ;;  %v2411_v9 = vpop.f32.mrb[44].mxu1 }
 0x202   :  { %v656_v7 = vadd.f32 %v2411_v9, %v2829_v35  ;;  %v647_v21 = vpop.f32.mrb[45].mxu1 }
 0x203   :  { %2453 = vmatprep.mubr.bf16.mxu0 %v706_v32  ;;  %v648_v22 = vadd.f32 %v2829_v35, %v647_v21  ;;  %v2412_v23 = vpop.f32.mrb[46].mxu1 }
 0x204   :  { %2454 = vmatmul.mubr.bf16.gmra.mrb[40].mxu0 %v707_v20  ;;  %v692_v24 = vmax.f32 %v656_v7, 0.0  ;;  %v659_v25 = vadd.f32 %v2412_v23, %v2829_v35  ;;  %v650_v26 = vpop.f32.mrb[47].mxu1 }
 0x205   :  { %v690_v27 = vmax.f32 %v648_v22, 0.0  ;;  %v651_v28 = vadd.f32 %v2829_v35, %v650_v26  ;;  %v2868_v35 = vld [vmem:[%s3100_s6] ss:$0 sm:$0xff] }
 0x206   :  { %v693_v29 = vmax.f32 %v659_v25, 0.0 }
 0x207   :  { %v691_v30 = vmax.f32 %v651_v28, 0.0 }
 0x208   :  { %v709_v31 = vpack.c.bf16 %v693_v29, %v692_v24 }
 0x209   :  { %v708_v33 = vpack.c.bf16 %v691_v30, %v690_v27 }
 0x20b   :  { %2457 = vmatprep.mubr.bf16.mxu0 %v708_v33 }
 0x20c   :  { %2458 = vmatmul.mubr.bf16.gmra.mrb[44].mxu0 %v709_v31 }
 0x20d   :  { %1429 = vmatprep.mubr.bf16.mxu0 %v2601_v39 }
 0x2a7   :  { %v2431_v40 = vpop.f32.mrb[16].mxu0 }
 0x2a8   :  { %v824_v41 = vadd.f32 %v2431_v40, %v2868_v35  ;;  %v815_v42 = vpop.f32.mrb[17].mxu0 }
 0x2a9   :  { %v816_v43 = vadd.f32 %v2868_v35, %v815_v42  ;;  %v2432_v44 = vpop.f32.mrb[18].mxu0 }
 0x2aa   :  { %v827_v45 = vadd.f32 %v2432_v44, %v2868_v35  ;;  %v818_v46 = vpop.f32.mrb[19].mxu0  ;;  %v944_v48 = vmax.f32 %v824_v41, 0.0 }
 0x2ab   :  { %v819_v47 = vadd.f32 %v2868_v35, %v818_v46  ;;  %v942_v50 = vmax.f32 %v816_v43, 0.0 }
 0x2ac   :  { %v945_v49 = vmax.f32 %v827_v45, 0.0 }
 0x2ad   :  { %v943_v51 = vmax.f32 %v819_v47, 0.0 }
 0x2ae   :  { %v975_v52 = vpack.c.bf16 %v945_v49, %v944_v48 }
 0x2af   :  { %v974_v53 = vpack.c.bf16 %v943_v51, %v942_v50  ;;  %v2435_v54 = vpop.f32.mrb[20].mxu0 }
 0x2b0   :  { %v840_v55 = vadd.f32 %v2435_v54, %v2868_v35  ;;  %v831_v56 = vpop.f32.mrb[21].mxu0 }
 0x2b1   :  { %v832_v57 = vadd.f32 %v2868_v35, %v831_v56  ;;  %v2436_v58 = vpop.f32.mrb[22].mxu0  ;;  %1237 = vmatmul.mubr.bf16.vlgmr.msra.gmra.mrb[48].mxu1 %v974_v53  ;;  %1430 = vmatmul.mubr.bf16.vlgmr.msra.gmra.mrb[48].mxu0 %v974_v53 }
 0x2b2   :  { %v843_v59 = vadd.f32 %v2436_v58, %v2868_v35  ;;  %v834_v60 = vpop.f32.mrb[23].mxu0  ;;  %1246 = vmatprep.mubr.bf16.mxu1 %v2601_v39  ;;  %1439 = vmatprep.mubr.bf16.mxu0 %v2601_v39  ;;  %v948_v62 = vmax.f32 %v840_v55, 0.0 }
 0x2b3   :  { %v835_v61 = vadd.f32 %v2868_v35, %v834_v60  ;;  %v946_v0 = vmax.f32 %v832_v57, 0.0 }
 0x2b4   :  { %v949_v63 = vmax.f32 %v843_v59, 0.0 }
 0x2b5   :  { %v947_v1 = vmax.f32 %v835_v61, 0.0 }
 0x2b6   :  { %v977_v2 = vpack.c.bf16 %v949_v63, %v948_v62 }
 0x2b7   :  { %v976_v3 = vpack.c.bf16 %v947_v1, %v946_v0  ;;  %v2439_v4 = vpop.f32.mrb[24].mxu0 }
 0x2b8   :  { %v856_v5 = vadd.f32 %v2439_v4, %v2868_v35  ;;  %v847_v6 = vpop.f32.mrb[25].mxu0 }
 0x2b9   :  { %1247 = vmatmul.mubr.bf16.gmra.mrb[52].mxu1 %v975_v52  ;;  %1440 = vmatmul.mubr.bf16.gmra.mrb[52].mxu0 %v975_v52  ;;  %v848_v8 = vadd.f32 %v2868_v35, %v847_v6  ;;  %v2440_v10 = vpop.f32.mrb[26].mxu0 }
 0x2ba   :  { %v952_v11 = vmax.f32 %v856_v5, 0.0  ;;  %v859_v12 = vadd.f32 %v2440_v10, %v2868_v35  ;;  %v850_v13 = vpop.f32.mrb[27].mxu0  ;;  %1256 = vmatprep.mubr.bf16.mxu1 %v2601_v39  ;;  %1449 = vmatprep.mubr.bf16.mxu0 %v2601_v39 }
 0x2bb   :  { %v950_v14 = vmax.f32 %v848_v8, 0.0  ;;  %v851_v15 = vadd.f32 %v2868_v35, %v850_v13 }
 0x2bc   :  { %v953_v16 = vmax.f32 %v859_v12, 0.0 }
 0x2bd   :  { %v951_v17 = vmax.f32 %v851_v15, 0.0 }
 0x2be   :  { %v979_v18 = vpack.c.bf16 %v953_v16, %v952_v11 }
 0x2bf   :  { %v978_v19 = vpack.c.bf16 %v951_v17, %v950_v14  ;;  %v2443_v20 = vpop.f32.mrb[28].mxu0 }
 0x2c0   :  { %v872_v32 = vadd.f32 %v2443_v20, %v2868_v35  ;;  %v863_v9 = vpop.f32.mrb[29].mxu0 }
 0x2c1   :  { %1257 = vmatmul.mubr.bf16.gmra.mrb[56].mxu1 %v976_v3  ;;  %1450 = vmatmul.mubr.bf16.gmra.mrb[56].mxu0 %v976_v3  ;;  %v864_v7 = vadd.f32 %v2868_v35, %v863_v9  ;;  %v2444_v21 = vpop.f32.mrb[30].mxu0 }
 0x2c2   :  { %1266 = vmatprep.mubr.bf16.mxu1 %v2601_v39  ;;  %1459 = vmatprep.mubr.bf16.mxu0 %v2601_v39  ;;  %v956_v22 = vmax.f32 %v872_v32, 0.0  ;;  %v875_v23 = vadd.f32 %v2444_v21, %v2868_v35  ;;  %v866_v24 = vpop.f32.mrb[31].mxu0 }
 0x2c3   :  { %v954_v25 = vmax.f32 %v864_v7, 0.0  ;;  %v867_v26 = vadd.f32 %v2868_v35, %v866_v24 }
 0x2c4   :  { %v957_v27 = vmax.f32 %v875_v23, 0.0 }
 0x2c5   :  { %v955_v28 = vmax.f32 %v867_v26, 0.0 }
 0x2c6   :  { %v2892_v29 = vpack.c.bf16 %v957_v27, %v956_v22 }
 0x2c7   :  { %v980_v30 = vpack.c.bf16 %v955_v28, %v954_v25  ;;  %v2447_v31 = vpop.f32.mrb[32].mxu0  ;;  %v1022_v28 = vld [vmem:[%s3102_s8] sm:$0xf]  ;;  %s2602_s8 = smov [#allocation5]  }
 0x2c8   :  { %v888_v33 = vadd.f32 %v2447_v31, %v2868_v35  ;;  %v879_v34 = vpop.f32.mrb[33].mxu0  ;;  %s2043_s28 = sshll.u32 %s2602_s8, 4  ;;  %s2044_s28 = int_to_ptr.vmem [resolvable:$true] %s2043_s28 }
 0x2c9   :  { %1267 = vmatmul.mubr.bf16.gmra.mrb[60].mxu1 %v977_v2  ;;  %1460 = vmatmul.mubr.bf16.gmra.mrb[60].mxu0 %v977_v2  ;;  %v880_v36 = vadd.f32 %v2868_v35, %v879_v34  ;;  %v2448_v37 = vpop.f32.mrb[34].mxu0  ;;  %s2572_s0 = scalar_lea.vmem %s2044_s28, 8192  ;;  %p2577_p9 = scmp.lt.s32.totalorder %s2044_s28, %s2044_s28 }
 0x2ca   :  { %1276 = vmatprep.mubr.bf16.mxu1 %v2601_v39  ;;  %1469 = vmatprep.mubr.bf16.mxu0 %v2601_v39  ;;  %v960_v38 = vmax.f32 %v888_v33, 0.0  ;;  %v891_v40 = vadd.f32 %v2448_v37, %v2868_v35  ;;  %v882_v41 = vpop.f32.mrb[35].mxu0  ;;  %p2573_p8 = scmp.ne.s32.totalorder %s2044_s28, %s2572_s0  ;;  %p2578_p10 = scmp.lt.s32.totalorder %s2572_s0, %s2572_s0 }
 0x2cb   :  { %v958_v42 = vmax.f32 %v880_v36, 0.0  ;;  %v883_v43 = vadd.f32 %v2868_v35, %v882_v41 }
 0x2cc   :  { %v961_v44 = vmax.f32 %v891_v40, 0.0  ;;  %p2579_p11 = por %p2578_p10, %p2577_p9 }
 0x2cd   :  { %v959_v45 = vmax.f32 %v883_v43, 0.0 }
 0x2ce   :  { %v2900_v46 = vpack.c.bf16 %v961_v44, %v960_v38  ;;  %p2580_p12 = pnand %p2579_p11, %p2573_p8 }
 0x2cf   :  { %v982_v47 = vpack.c.bf16 %v959_v45, %v958_v42  ;;  %v2451_v48 = vpop.f32.mrb[36].mxu0 }
 0x2d0   :  { %v904_v49 = vadd.f32 %v2451_v48, %v2868_v35  ;;  %v895_v50 = vpop.f32.mrb[37].mxu0 }
 0x2d1   :  { %1277 = vmatmul.mubr.bf16.gmra.mrb[64].mxu1 %v978_v19  ;;  %1470 = vmatmul.mubr.bf16.gmra.mrb[64].mxu0 %v978_v19  ;;  %v896_v51 = vadd.f32 %v2868_v35, %v895_v50  ;;  %v2452_v52 = vpop.f32.mrb[38].mxu0 }
 0x2d2   :  { %1286 = vmatprep.mubr.bf16.mxu1 %v2601_v39  ;;  %1479 = vmatprep.mubr.bf16.mxu0 %v2601_v39  ;;  %v964_v53 = vmax.f32 %v904_v49, 0.0  ;;  %v907_v54 = vadd.f32 %v2452_v52, %v2868_v35  ;;  %v898_v55 = vpop.f32.mrb[39].mxu0 }
 0x2d3   :  { %v962_v56 = vmax.f32 %v896_v51, 0.0  ;;  %v899_v57 = vadd.f32 %v2868_v35, %v898_v55 }
 0x2d4   :  { %v965_v58 = vmax.f32 %v907_v54, 0.0 }
 0x2d5   :  { %v963_v59 = vmax.f32 %v899_v57, 0.0 }
 0x2d6   :  { %v985_v60 = vpack.c.bf16 %v965_v58, %v964_v53 }
 0x2d7   :  { %v984_v61 = vpack.c.bf16 %v963_v59, %v962_v56  ;;  %v2455_v62 = vpop.f32.mrb[40].mxu0 }
 0x2d8   :  { %v920_v63 = vadd.f32 %v2455_v62, %v2868_v35  ;;  %v911_v0 = vpop.f32.mrb[41].mxu0 }
 0x2d9   :  { %1287 = vmatmul.mubr.bf16.gmra.mrb[68].mxu1 %v979_v18  ;;  %1480 = vmatmul.mubr.bf16.gmra.mrb[68].mxu0 %v979_v18  ;;  %v912_v1 = vadd.f32 %v2868_v35, %v911_v0  ;;  %v2456_v2 = vpop.f32.mrb[42].mxu0 }
 0x2da   :  { %1296 = vmatprep.mubr.bf16.mxu1 %v2601_v39  ;;  %1489 = vmatprep.mubr.bf16.mxu0 %v2601_v39  ;;  %v968_v3 = vmax.f32 %v920_v63, 0.0  ;;  %v923_v4 = vadd.f32 %v2456_v2, %v2868_v35  ;;  %v914_v5 = vpop.f32.mrb[43].mxu0 }
 0x2db   :  { %v966_v6 = vmax.f32 %v912_v1, 0.0  ;;  %v915_v8 = vadd.f32 %v2868_v35, %v914_v5 }
 0x2dc   :  { %v969_v10 = vmax.f32 %v923_v4, 0.0 }
 0x2dd   :  { %v967_v11 = vmax.f32 %v915_v8, 0.0 }
 0x2de   :  { %v987_v12 = vpack.c.bf16 %v969_v10, %v968_v3 }
 0x2df   :  { %v986_v13 = vpack.c.bf16 %v967_v11, %v966_v6  ;;  %v2459_v14 = vpop.f32.mrb[44].mxu0 }
 0x2e0   :  { %v936_v15 = vadd.f32 %v2459_v14, %v2868_v35  ;;  %v927_v16 = vpop.f32.mrb[45].mxu0 }
 0x2e1   :  { %1297 = vmatmul.mubr.bf16.gmra.mrb[72].mxu1 %v980_v30  ;;  %1490 = vmatmul.mubr.bf16.gmra.mrb[72].mxu0 %v980_v30  ;;  %v928_v17 = vadd.f32 %v2868_v35, %v927_v16  ;;  %v2460_v18 = vpop.f32.mrb[46].mxu0 }
 0x2e2   :  { %1306 = vmatprep.mubr.bf16.mxu1 %v2601_v39  ;;  %1499 = vmatprep.mubr.bf16.mxu0 %v2601_v39  ;;  %v972_v19 = vmax.f32 %v936_v15, 0.0  ;;  %v939_v20 = vadd.f32 %v2460_v18, %v2868_v35  ;;  %v930_v32 = vpop.f32.mrb[47].mxu0 }
 0x2e3   :  { %v970_v9 = vmax.f32 %v928_v17, 0.0  ;;  %v931_v7 = vadd.f32 %v2868_v35, %v930_v32  ;;  %v1024_v35 = vlaneseq }
 0x2e4   :  { %v973_v21 = vmax.f32 %v939_v20, 0.0 }
 0x2e5   :  { %v971_v22 = vmax.f32 %v931_v7, 0.0  ;;  %v1025_v25 = vshrl.u32 %v1024_v35, 7 }
 0x2e6   :  { %v989_v23 = vpack.c.bf16 %v973_v21, %v972_v19 }
 0x2e7   :  { %v988_v24 = vpack.c.bf16 %v971_v22, %v970_v9  ;;  %v1026_v26 = vsub.s32 0, %v1025_v25  ;;  %v1034_v27 = vsub.s32 2, %v1025_v25  ;;  %v1038_v30 = vsub.s32 3, %v1025_v25 }
 0x2e9   :  { %1307 = vmatmul.mubr.bf16.gmra.mrb[76].mxu1 %v2892_v29  ;;  %1500 = vmatmul.mubr.bf16.gmra.mrb[76].mxu0 %v2892_v29  ;;  %v1030_v29 = vsub.s32 1, %v1025_v25  ;;  %v2943_v31 = vrot.slane %v1022_v28, %v1026_v26  ;;  %v2945_v33 = vrot.slane %v1022_v28, %v1034_v27  ;;  %v2949_v36 = vrot.slane %v1022_v28, %v1038_v30 }
 0x2ea   :  { %1316 = vmatprep.mubr.bf16.mxu1 %v2601_v39  ;;  %1509 = vmatprep.mubr.bf16.mxu0 %v2601_v39 }
 0x2eb   :  { %v2947_v34 = vrot.slane %v1022_v28, %v1030_v29 }
 0x2f1   :  { %1317 = vmatmul.mubr.bf16.gmra.mrb[80].mxu1 %v982_v47  ;;  %1510 = vmatmul.mubr.bf16.gmra.mrb[80].mxu0 %v982_v47 }
 0x2f2   :  { %1326 = vmatprep.mubr.bf16.mxu1 %v2601_v39  ;;  %1519 = vmatprep.mubr.bf16.mxu0 %v2601_v39 }
 0x2f9   :  { %1327 = vmatmul.mubr.bf16.gmra.mrb[84].mxu1 %v2900_v46  ;;  %1520 = vmatmul.mubr.bf16.gmra.mrb[84].mxu0 %v2900_v46 }
 0x2fa   :  { %1336 = vmatprep.mubr.bf16.mxu1 %v2601_v39  ;;  %1529 = vmatprep.mubr.bf16.mxu0 %v2601_v39 }
 0x301   :  { %1337 = vmatmul.mubr.bf16.gmra.mrb[88].mxu1 %v984_v61  ;;  %1530 = vmatmul.mubr.bf16.gmra.mrb[88].mxu0 %v984_v61 }
 0x302   :  { %1346 = vmatprep.mubr.bf16.mxu1 %v2601_v39  ;;  %1539 = vmatprep.mubr.bf16.mxu0 %v2601_v39 }
 0x309   :  { %1347 = vmatmul.mubr.bf16.gmra.mrb[92].mxu1 %v985_v60  ;;  %1540 = vmatmul.mubr.bf16.gmra.mrb[92].mxu0 %v985_v60 }
 0x30a   :  { %1356 = vmatprep.mubr.bf16.mxu1 %v2601_v39  ;;  %1549 = vmatprep.mubr.bf16.mxu0 %v2601_v39 }
 0x311   :  { %1357 = vmatmul.mubr.bf16.gmra.mrb[96].mxu1 %v986_v13  ;;  %1550 = vmatmul.mubr.bf16.gmra.mrb[96].mxu0 %v986_v13 }
 0x312   :  { %1366 = vmatprep.mubr.bf16.mxu1 %v2601_v39  ;;  %1559 = vmatprep.mubr.bf16.mxu0 %v2601_v39 }
 0x319   :  { %1367 = vmatmul.mubr.bf16.gmra.mrb[100].mxu1 %v987_v12  ;;  %1560 = vmatmul.mubr.bf16.gmra.mrb[100].mxu0 %v987_v12 }
 0x31a   :  { %1376 = vmatprep.mubr.bf16.mxu1 %v2601_v39  ;;  %1569 = vmatprep.mubr.bf16.mxu0 %v2601_v39 }
 0x321   :  { %1377 = vmatmul.mubr.bf16.gmra.mrb[104].mxu1 %v988_v24  ;;  %1570 = vmatmul.mubr.bf16.gmra.mrb[104].mxu0 %v988_v24 }
 0x322   :  { %1386 = vmatprep.mubr.bf16.mxu1 %v2601_v39  ;;  %1579 = vmatprep.mubr.bf16.mxu0 %v2601_v39 }
 0x329   :  { %1387 = vmatmul.mubr.bf16.gmra.mrb[108].mxu1 %v989_v23  ;;  %1580 = vmatmul.mubr.bf16.gmra.mrb[108].mxu0 %v989_v23 }
 0x384   :  { %v1238_v39 = vpop.f32.mrb[48].mxu1  ;;  %v1431_v37 = vpop.f32.mrb[48].mxu0 }
 0x385   :  { %v1239_v38 = vadd.f32 %v1238_v39, %v2943_v31  ;;  %v1432_v40 = vadd.f32 %v1431_v37, %v2945_v33  ;;  %v1240_v41 = vpop.f32.mrb[49].mxu1  ;;  %v1433_v42 = vpop.f32.mrb[49].mxu0 }
 0x386   :  { %v1241_v43 = vadd.f32 %v1240_v41, %v2947_v34  ;;  %v1434_v44 = vadd.f32 %v1433_v42, %v2949_v36  ;;  %v1242_v45 = vpop.f32.mrb[50].mxu1  ;;  %v1435_v46 = vpop.f32.mrb[50].mxu0 }
 0x387   :  { %v1243_v47 = vadd.f32 %v1242_v45, %v2943_v31  ;;  %v1436_v48 = vadd.f32 %v1435_v46, %v2945_v33  ;;  %v1244_v49 = vpop.f32.mrb[51].mxu1  ;;  %v1437_v50 = vpop.f32.mrb[51].mxu0 }
 0x388   :  { %v2202_v51 = vpack.c.bf16 %v1241_v43, %v1239_v38  ;;  %v2203_v52 = vpack.c.bf16 %v1434_v44, %v1432_v40  ;;  %v1245_v53 = vadd.f32 %v1244_v49, %v2947_v34  ;;  %v1438_v54 = vadd.f32 %v1437_v50, %v2949_v36 }
 0x38a   :  { %1974 = vst [vmem:[#allocation5] sm:$0xff] %v2202_v51  ;;  %1975 = vst [vmem:[#allocation5 + $0x8] sm:$0xff] %v2203_v52  ;;  %v2204_v55 = vpack.c.bf16 %v1245_v53, %v1243_v47  ;;  %v2205_v56 = vpack.c.bf16 %v1438_v54, %v1436_v48 }
 0x38c   :  { %1976 = vst [vmem:[#allocation5 + $0x10] sm:$0xff] %v2204_v55  ;;  %1977 = vst [vmem:[#allocation5 + $0x18] sm:$0xff] %v2205_v56  ;;  %v1248_v57 = vpop.f32.mrb[52].mxu1  ;;  %v1441_v58 = vpop.f32.mrb[52].mxu0 }
 0x38d   :  { %v1249_v59 = vadd.f32 %v1248_v57, %v2943_v31  ;;  %v1442_v60 = vadd.f32 %v1441_v58, %v2945_v33  ;;  %v1250_v61 = vpop.f32.mrb[53].mxu1  ;;  %v1443_v62 = vpop.f32.mrb[53].mxu0 }
 0x38e   :  { %v1251_v63 = vadd.f32 %v1250_v61, %v2947_v34  ;;  %v1444_v0 = vadd.f32 %v1443_v62, %v2949_v36  ;;  %v1252_v1 = vpop.f32.mrb[54].mxu1  ;;  %v1445_v2 = vpop.f32.mrb[54].mxu0 }
 0x38f   :  { %v1253_v3 = vadd.f32 %v1252_v1, %v2943_v31  ;;  %v1446_v4 = vadd.f32 %v1445_v2, %v2945_v33  ;;  %v1254_v5 = vpop.f32.mrb[55].mxu1  ;;  %v1447_v6 = vpop.f32.mrb[55].mxu0 }
 0x390   :  { %v2206_v8 = vpack.c.bf16 %v1251_v63, %v1249_v59  ;;  %v2207_v10 = vpack.c.bf16 %v1444_v0, %v1442_v60  ;;  %v1255_v11 = vadd.f32 %v1254_v5, %v2947_v34  ;;  %v1448_v12 = vadd.f32 %v1447_v6, %v2949_v36 }
 0x392   :  { %1978 = vst [vmem:[#allocation5 + $0x20] sm:$0xff] %v2206_v8  ;;  %1979 = vst [vmem:[#allocation5 + $0x28] sm:$0xff] %v2207_v10  ;;  %v2208_v13 = vpack.c.bf16 %v1255_v11, %v1253_v3  ;;  %v2209_v14 = vpack.c.bf16 %v1448_v12, %v1446_v4 }
 0x394   :  { %1980 = vst [vmem:[#allocation5 + $0x30] sm:$0xff] %v2208_v13  ;;  %1981 = vst [vmem:[#allocation5 + $0x38] sm:$0xff] %v2209_v14  ;;  %v1258_v15 = vpop.f32.mrb[56].mxu1  ;;  %v1451_v16 = vpop.f32.mrb[56].mxu0 }
 0x395   :  { %v1259_v17 = vadd.f32 %v1258_v15, %v2943_v31  ;;  %v1452_v18 = vadd.f32 %v1451_v16, %v2945_v33  ;;  %v1260_v19 = vpop.f32.mrb[57].mxu1  ;;  %v1453_v20 = vpop.f32.mrb[57].mxu0 }
 0x396   :  { %v1261_v32 = vadd.f32 %v1260_v19, %v2947_v34  ;;  %v1454_v9 = vadd.f32 %v1453_v20, %v2949_v36  ;;  %v1262_v7 = vpop.f32.mrb[58].mxu1  ;;  %v1455_v21 = vpop.f32.mrb[58].mxu0 }
 0x397   :  { %v1263_v22 = vadd.f32 %v1262_v7, %v2943_v31  ;;  %v1456_v23 = vadd.f32 %v1455_v21, %v2945_v33  ;;  %v1264_v24 = vpop.f32.mrb[59].mxu1  ;;  %v1457_v35 = vpop.f32.mrb[59].mxu0 }
 0x398   :  { %v2210_v25 = vpack.c.bf16 %v1261_v32, %v1259_v17  ;;  %v2211_v26 = vpack.c.bf16 %v1454_v9, %v1452_v18  ;;  %v1265_v27 = vadd.f32 %v1264_v24, %v2947_v34  ;;  %v1458_v28 = vadd.f32 %v1457_v35, %v2949_v36 }
 0x39a   :  { %1982 = vst [vmem:[#allocation5 + $0x40] sm:$0xff] %v2210_v25  ;;  %1983 = vst [vmem:[#allocation5 + $0x48] sm:$0xff] %v2211_v26  ;;  %v2212_v29 = vpack.c.bf16 %v1265_v27, %v1263_v22  ;;  %v2213_v30 = vpack.c.bf16 %v1458_v28, %v1456_v23 }
 0x39c   :  { %1984 = vst [vmem:[#allocation5 + $0x50] sm:$0xff] %v2212_v29  ;;  %1985 = vst [vmem:[#allocation5 + $0x58] sm:$0xff] %v2213_v30  ;;  %v1268_v39 = vpop.f32.mrb[60].mxu1  ;;  %v1461_v37 = vpop.f32.mrb[60].mxu0 }
 0x39d   :  { %v1269_v38 = vadd.f32 %v1268_v39, %v2943_v31  ;;  %v1462_v40 = vadd.f32 %v1461_v37, %v2945_v33  ;;  %v1270_v41 = vpop.f32.mrb[61].mxu1  ;;  %v1463_v42 = vpop.f32.mrb[61].mxu0 }
 0x39e   :  { %v1271_v43 = vadd.f32 %v1270_v41, %v2947_v34  ;;  %v1464_v44 = vadd.f32 %v1463_v42, %v2949_v36  ;;  %v1272_v45 = vpop.f32.mrb[62].mxu1  ;;  %v1465_v46 = vpop.f32.mrb[62].mxu0 }
 0x39f   :  { %v1273_v47 = vadd.f32 %v1272_v45, %v2943_v31  ;;  %v1466_v48 = vadd.f32 %v1465_v46, %v2945_v33  ;;  %v1274_v49 = vpop.f32.mrb[63].mxu1  ;;  %v1467_v50 = vpop.f32.mrb[63].mxu0 }
 0x3a0   :  { %v2214_v51 = vpack.c.bf16 %v1271_v43, %v1269_v38  ;;  %v2215_v52 = vpack.c.bf16 %v1464_v44, %v1462_v40  ;;  %v1275_v53 = vadd.f32 %v1274_v49, %v2947_v34  ;;  %v1468_v54 = vadd.f32 %v1467_v50, %v2949_v36 }
 0x3a2   :  { %1986 = vst [vmem:[#allocation5 + $0x60] sm:$0xff] %v2214_v51  ;;  %1987 = vst [vmem:[#allocation5 + $0x68] sm:$0xff] %v2215_v52  ;;  %v2216_v55 = vpack.c.bf16 %v1275_v53, %v1273_v47  ;;  %v2217_v56 = vpack.c.bf16 %v1468_v54, %v1466_v48 }
 0x3a4   :  { %1988 = vst [vmem:[#allocation5 + $0x70] sm:$0xff] %v2216_v55  ;;  %1989 = vst [vmem:[#allocation5 + $0x78] sm:$0xff] %v2217_v56  ;;  %v1278_v57 = vpop.f32.mrb[64].mxu1  ;;  %v1471_v58 = vpop.f32.mrb[64].mxu0 }
 0x3a5   :  { %v1279_v59 = vadd.f32 %v1278_v57, %v2943_v31  ;;  %v1472_v60 = vadd.f32 %v1471_v58, %v2945_v33  ;;  %v1280_v61 = vpop.f32.mrb[65].mxu1  ;;  %v1473_v62 = vpop.f32.mrb[65].mxu0 }
 0x3a6   :  { %v1281_v63 = vadd.f32 %v1280_v61, %v2947_v34  ;;  %v1474_v0 = vadd.f32 %v1473_v62, %v2949_v36  ;;  %v1282_v1 = vpop.f32.mrb[66].mxu1  ;;  %v1475_v2 = vpop.f32.mrb[66].mxu0 }
 0x3a7   :  { %v1283_v3 = vadd.f32 %v1282_v1, %v2943_v31  ;;  %v1476_v4 = vadd.f32 %v1475_v2, %v2945_v33  ;;  %v1284_v5 = vpop.f32.mrb[67].mxu1  ;;  %v1477_v6 = vpop.f32.mrb[67].mxu0 }
 0x3a8   :  { %v2218_v8 = vpack.c.bf16 %v1281_v63, %v1279_v59  ;;  %v2219_v10 = vpack.c.bf16 %v1474_v0, %v1472_v60  ;;  %v1285_v11 = vadd.f32 %v1284_v5, %v2947_v34  ;;  %v1478_v12 = vadd.f32 %v1477_v6, %v2949_v36 }
 0x3aa   :  { %1990 = vst [vmem:[#allocation5 + $0x80] sm:$0xff] %v2218_v8  ;;  %1991 = vst [vmem:[#allocation5 + $0x88] sm:$0xff] %v2219_v10  ;;  %v2220_v13 = vpack.c.bf16 %v1285_v11, %v1283_v3  ;;  %v2221_v14 = vpack.c.bf16 %v1478_v12, %v1476_v4 }
 0x3ac   :  { %1992 = vst [vmem:[#allocation5 + $0x90] sm:$0xff] %v2220_v13  ;;  %1993 = vst [vmem:[#allocation5 + $0x98] sm:$0xff] %v2221_v14  ;;  %v1288_v15 = vpop.f32.mrb[68].mxu1  ;;  %v1481_v16 = vpop.f32.mrb[68].mxu0 }
 0x3ad   :  { %v1289_v17 = vadd.f32 %v1288_v15, %v2943_v31  ;;  %v1482_v18 = vadd.f32 %v1481_v16, %v2945_v33  ;;  %v1290_v19 = vpop.f32.mrb[69].mxu1  ;;  %v1483_v20 = vpop.f32.mrb[69].mxu0 }
 0x3ae   :  { %v1291_v32 = vadd.f32 %v1290_v19, %v2947_v34  ;;  %v1484_v9 = vadd.f32 %v1483_v20, %v2949_v36  ;;  %v1292_v7 = vpop.f32.mrb[70].mxu1  ;;  %v1485_v21 = vpop.f32.mrb[70].mxu0 }
 0x3af   :  { %v1293_v22 = vadd.f32 %v1292_v7, %v2943_v31  ;;  %v1486_v23 = vadd.f32 %v1485_v21, %v2945_v33  ;;  %v1294_v24 = vpop.f32.mrb[71].mxu1  ;;  %v1487_v35 = vpop.f32.mrb[71].mxu0 }
 0x3b0   :  { %v2222_v25 = vpack.c.bf16 %v1291_v32, %v1289_v17  ;;  %v2223_v26 = vpack.c.bf16 %v1484_v9, %v1482_v18  ;;  %v1295_v27 = vadd.f32 %v1294_v24, %v2947_v34  ;;  %v1488_v28 = vadd.f32 %v1487_v35, %v2949_v36 }
 0x3b2   :  { %1994 = vst [vmem:[#allocation5 + $0xa0] sm:$0xff] %v2222_v25  ;;  %1995 = vst [vmem:[#allocation5 + $0xa8] sm:$0xff] %v2223_v26  ;;  %v2224_v29 = vpack.c.bf16 %v1295_v27, %v1293_v22  ;;  %v2225_v30 = vpack.c.bf16 %v1488_v28, %v1486_v23 }
 0x3b4   :  { %1996 = vst [vmem:[#allocation5 + $0xb0] sm:$0xff] %v2224_v29  ;;  %1997 = vst [vmem:[#allocation5 + $0xb8] sm:$0xff] %v2225_v30  ;;  %v1298_v39 = vpop.f32.mrb[72].mxu1  ;;  %v1491_v37 = vpop.f32.mrb[72].mxu0 }
 0x3b5   :  { %v1299_v38 = vadd.f32 %v1298_v39, %v2943_v31  ;;  %v1492_v40 = vadd.f32 %v1491_v37, %v2945_v33  ;;  %v1300_v41 = vpop.f32.mrb[73].mxu1  ;;  %v1493_v42 = vpop.f32.mrb[73].mxu0 }
 0x3b6   :  { %v1301_v43 = vadd.f32 %v1300_v41, %v2947_v34  ;;  %v1494_v44 = vadd.f32 %v1493_v42, %v2949_v36  ;;  %v1302_v45 = vpop.f32.mrb[74].mxu1  ;;  %v1495_v46 = vpop.f32.mrb[74].mxu0 }
 0x3b7   :  { %v1303_v47 = vadd.f32 %v1302_v45, %v2943_v31  ;;  %v1496_v48 = vadd.f32 %v1495_v46, %v2945_v33  ;;  %v1304_v49 = vpop.f32.mrb[75].mxu1  ;;  %v1497_v50 = vpop.f32.mrb[75].mxu0 }
 0x3b8   :  { %v2226_v51 = vpack.c.bf16 %v1301_v43, %v1299_v38  ;;  %v2227_v52 = vpack.c.bf16 %v1494_v44, %v1492_v40  ;;  %v1305_v53 = vadd.f32 %v1304_v49, %v2947_v34  ;;  %v1498_v54 = vadd.f32 %v1497_v50, %v2949_v36 }
 0x3ba   :  { %1998 = vst [vmem:[#allocation5 + $0xc0] sm:$0xff] %v2226_v51  ;;  %1999 = vst [vmem:[#allocation5 + $0xc8] sm:$0xff] %v2227_v52  ;;  %v2228_v55 = vpack.c.bf16 %v1305_v53, %v1303_v47  ;;  %v2229_v56 = vpack.c.bf16 %v1498_v54, %v1496_v48 }
 0x3bc   :  { %2000 = vst [vmem:[#allocation5 + $0xd0] sm:$0xff] %v2228_v55  ;;  %2001 = vst [vmem:[#allocation5 + $0xd8] sm:$0xff] %v2229_v56  ;;  %v1308_v57 = vpop.f32.mrb[76].mxu1  ;;  %v1501_v58 = vpop.f32.mrb[76].mxu0 }
 0x3bd   :  { %v1309_v59 = vadd.f32 %v1308_v57, %v2943_v31  ;;  %v1502_v60 = vadd.f32 %v1501_v58, %v2945_v33  ;;  %v1310_v61 = vpop.f32.mrb[77].mxu1  ;;  %v1503_v62 = vpop.f32.mrb[77].mxu0 }
 0x3be   :  { %v1311_v63 = vadd.f32 %v1310_v61, %v2947_v34  ;;  %v1504_v0 = vadd.f32 %v1503_v62, %v2949_v36  ;;  %v1312_v1 = vpop.f32.mrb[78].mxu1  ;;  %v1505_v2 = vpop.f32.mrb[78].mxu0 }
 0x3bf   :  { %v1313_v3 = vadd.f32 %v1312_v1, %v2943_v31  ;;  %v1506_v4 = vadd.f32 %v1505_v2, %v2945_v33  ;;  %v1314_v5 = vpop.f32.mrb[79].mxu1  ;;  %v1507_v6 = vpop.f32.mrb[79].mxu0 }
 0x3c0   :  { %v2230_v8 = vpack.c.bf16 %v1311_v63, %v1309_v59  ;;  %v2231_v10 = vpack.c.bf16 %v1504_v0, %v1502_v60  ;;  %v1315_v11 = vadd.f32 %v1314_v5, %v2947_v34  ;;  %v1508_v12 = vadd.f32 %v1507_v6, %v2949_v36 }
 0x3c2   :  { %2002 = vst [vmem:[#allocation5 + $0xe0] sm:$0xff] %v2230_v8  ;;  %2003 = vst [vmem:[#allocation5 + $0xe8] sm:$0xff] %v2231_v10  ;;  %v2232_v13 = vpack.c.bf16 %v1315_v11, %v1313_v3  ;;  %v2233_v14 = vpack.c.bf16 %v1508_v12, %v1506_v4 }
 0x3c4   :  { %2004 = vst [vmem:[#allocation5 + $0xf0] sm:$0xff] %v2232_v13  ;;  %2005 = vst [vmem:[#allocation5 + $0xf8] sm:$0xff] %v2233_v14  ;;  %v1318_v15 = vpop.f32.mrb[80].mxu1  ;;  %v1511_v16 = vpop.f32.mrb[80].mxu0 }
 0x3c5   :  { %v1319_v17 = vadd.f32 %v1318_v15, %v2943_v31  ;;  %v1512_v18 = vadd.f32 %v1511_v16, %v2945_v33  ;;  %v1320_v19 = vpop.f32.mrb[81].mxu1  ;;  %v1513_v20 = vpop.f32.mrb[81].mxu0 }
 0x3c6   :  { %v1321_v32 = vadd.f32 %v1320_v19, %v2947_v34  ;;  %v1514_v9 = vadd.f32 %v1513_v20, %v2949_v36  ;;  %v1322_v7 = vpop.f32.mrb[82].mxu1  ;;  %v1515_v21 = vpop.f32.mrb[82].mxu0 }
 0x3c7   :  { %v1323_v22 = vadd.f32 %v1322_v7, %v2943_v31  ;;  %v1516_v23 = vadd.f32 %v1515_v21, %v2945_v33  ;;  %v1324_v24 = vpop.f32.mrb[83].mxu1  ;;  %v1517_v35 = vpop.f32.mrb[83].mxu0 }
 0x3c8   :  { %v2234_v25 = vpack.c.bf16 %v1321_v32, %v1319_v17  ;;  %v2235_v26 = vpack.c.bf16 %v1514_v9, %v1512_v18  ;;  %v1325_v27 = vadd.f32 %v1324_v24, %v2947_v34  ;;  %v1518_v28 = vadd.f32 %v1517_v35, %v2949_v36 }
 0x3ca   :  { %2006 = vst [vmem:[#allocation5 + $0x100] sm:$0xff] %v2234_v25  ;;  %2007 = vst [vmem:[#allocation5 + $0x108] sm:$0xff] %v2235_v26  ;;  %v2236_v29 = vpack.c.bf16 %v1325_v27, %v1323_v22  ;;  %v2237_v30 = vpack.c.bf16 %v1518_v28, %v1516_v23 }
 0x3cc   :  { %2008 = vst [vmem:[#allocation5 + $0x110] sm:$0xff] %v2236_v29  ;;  %2009 = vst [vmem:[#allocation5 + $0x118] sm:$0xff] %v2237_v30  ;;  %v1328_v39 = vpop.f32.mrb[84].mxu1  ;;  %v1521_v37 = vpop.f32.mrb[84].mxu0 }
 0x3cd   :  { %v1329_v38 = vadd.f32 %v1328_v39, %v2943_v31  ;;  %v1522_v40 = vadd.f32 %v1521_v37, %v2945_v33  ;;  %v1330_v41 = vpop.f32.mrb[85].mxu1  ;;  %v1523_v42 = vpop.f32.mrb[85].mxu0 }
 0x3ce   :  { %v1331_v43 = vadd.f32 %v1330_v41, %v2947_v34  ;;  %v1524_v44 = vadd.f32 %v1523_v42, %v2949_v36  ;;  %v1332_v45 = vpop.f32.mrb[86].mxu1  ;;  %v1525_v46 = vpop.f32.mrb[86].mxu0 }
 0x3cf   :  { %v1333_v47 = vadd.f32 %v1332_v45, %v2943_v31  ;;  %v1526_v48 = vadd.f32 %v1525_v46, %v2945_v33  ;;  %v1334_v49 = vpop.f32.mrb[87].mxu1  ;;  %v1527_v50 = vpop.f32.mrb[87].mxu0 }
 0x3d0   :  { %v2238_v51 = vpack.c.bf16 %v1331_v43, %v1329_v38  ;;  %v2239_v52 = vpack.c.bf16 %v1524_v44, %v1522_v40  ;;  %v1335_v53 = vadd.f32 %v1334_v49, %v2947_v34  ;;  %v1528_v54 = vadd.f32 %v1527_v50, %v2949_v36 }
 0x3d2   :  { %2010 = vst [vmem:[#allocation5 + $0x120] sm:$0xff] %v2238_v51  ;;  %2011 = vst [vmem:[#allocation5 + $0x128] sm:$0xff] %v2239_v52  ;;  %v2240_v55 = vpack.c.bf16 %v1335_v53, %v1333_v47  ;;  %v2241_v56 = vpack.c.bf16 %v1528_v54, %v1526_v48 }
 0x3d4   :  { %2012 = vst [vmem:[#allocation5 + $0x130] sm:$0xff] %v2240_v55  ;;  %2013 = vst [vmem:[#allocation5 + $0x138] sm:$0xff] %v2241_v56  ;;  %v1338_v57 = vpop.f32.mrb[88].mxu1  ;;  %v1531_v58 = vpop.f32.mrb[88].mxu0 }
 0x3d5   :  { %v1339_v59 = vadd.f32 %v1338_v57, %v2943_v31  ;;  %v1532_v60 = vadd.f32 %v1531_v58, %v2945_v33  ;;  %v1340_v61 = vpop.f32.mrb[89].mxu1  ;;  %v1533_v62 = vpop.f32.mrb[89].mxu0 }
 0x3d6   :  { %v1341_v63 = vadd.f32 %v1340_v61, %v2947_v34  ;;  %v1534_v0 = vadd.f32 %v1533_v62, %v2949_v36  ;;  %v1342_v1 = vpop.f32.mrb[90].mxu1  ;;  %v1535_v2 = vpop.f32.mrb[90].mxu0 }
 0x3d7   :  { %v1343_v3 = vadd.f32 %v1342_v1, %v2943_v31  ;;  %v1536_v4 = vadd.f32 %v1535_v2, %v2945_v33  ;;  %v1344_v5 = vpop.f32.mrb[91].mxu1  ;;  %v1537_v6 = vpop.f32.mrb[91].mxu0 }
 0x3d8   :  { %v2242_v8 = vpack.c.bf16 %v1341_v63, %v1339_v59  ;;  %v2243_v10 = vpack.c.bf16 %v1534_v0, %v1532_v60  ;;  %v1345_v11 = vadd.f32 %v1344_v5, %v2947_v34  ;;  %v1538_v12 = vadd.f32 %v1537_v6, %v2949_v36 }
 0x3da   :  { %2014 = vst [vmem:[#allocation5 + $0x140] sm:$0xff] %v2242_v8  ;;  %2015 = vst [vmem:[#allocation5 + $0x148] sm:$0xff] %v2243_v10  ;;  %v2244_v13 = vpack.c.bf16 %v1345_v11, %v1343_v3  ;;  %v2245_v14 = vpack.c.bf16 %v1538_v12, %v1536_v4 }
 0x3dc   :  { %2016 = vst [vmem:[#allocation5 + $0x150] sm:$0xff] %v2244_v13  ;;  %2017 = vst [vmem:[#allocation5 + $0x158] sm:$0xff] %v2245_v14  ;;  %v1348_v15 = vpop.f32.mrb[92].mxu1  ;;  %v1541_v16 = vpop.f32.mrb[92].mxu0 }
 0x3dd   :  { %v1349_v17 = vadd.f32 %v1348_v15, %v2943_v31  ;;  %v1542_v18 = vadd.f32 %v1541_v16, %v2945_v33  ;;  %v1350_v19 = vpop.f32.mrb[93].mxu1  ;;  %v1543_v20 = vpop.f32.mrb[93].mxu0 }
 0x3de   :  { %v1351_v32 = vadd.f32 %v1350_v19, %v2947_v34  ;;  %v1544_v9 = vadd.f32 %v1543_v20, %v2949_v36  ;;  %v1352_v7 = vpop.f32.mrb[94].mxu1  ;;  %v1545_v21 = vpop.f32.mrb[94].mxu0 }
 0x3df   :  { %v1353_v22 = vadd.f32 %v1352_v7, %v2943_v31  ;;  %v1546_v23 = vadd.f32 %v1545_v21, %v2945_v33  ;;  %v1354_v24 = vpop.f32.mrb[95].mxu1  ;;  %v1547_v35 = vpop.f32.mrb[95].mxu0 }
 0x3e0   :  { %v2246_v25 = vpack.c.bf16 %v1351_v32, %v1349_v17  ;;  %v2247_v26 = vpack.c.bf16 %v1544_v9, %v1542_v18  ;;  %v1355_v27 = vadd.f32 %v1354_v24, %v2947_v34  ;;  %v1548_v28 = vadd.f32 %v1547_v35, %v2949_v36 }
 0x3e2   :  { %2018 = vst [vmem:[#allocation5 + $0x160] sm:$0xff] %v2246_v25  ;;  %2019 = vst [vmem:[#allocation5 + $0x168] sm:$0xff] %v2247_v26  ;;  %v2248_v29 = vpack.c.bf16 %v1355_v27, %v1353_v22  ;;  %v2249_v30 = vpack.c.bf16 %v1548_v28, %v1546_v23 }
 0x3e4   :  { %2020 = vst [vmem:[#allocation5 + $0x170] sm:$0xff] %v2248_v29  ;;  %2021 = vst [vmem:[#allocation5 + $0x178] sm:$0xff] %v2249_v30  ;;  %v1358_v39 = vpop.f32.mrb[96].mxu1  ;;  %v1551_v37 = vpop.f32.mrb[96].mxu0 }
 0x3e5   :  { %v1359_v38 = vadd.f32 %v1358_v39, %v2943_v31  ;;  %v1552_v40 = vadd.f32 %v1551_v37, %v2945_v33  ;;  %v1360_v41 = vpop.f32.mrb[97].mxu1  ;;  %v1553_v42 = vpop.f32.mrb[97].mxu0 }
 0x3e6   :  { %v1361_v43 = vadd.f32 %v1360_v41, %v2947_v34  ;;  %v1554_v44 = vadd.f32 %v1553_v42, %v2949_v36  ;;  %v1362_v45 = vpop.f32.mrb[98].mxu1  ;;  %v1555_v46 = vpop.f32.mrb[98].mxu0 }
 0x3e7   :  { %v1363_v47 = vadd.f32 %v1362_v45, %v2943_v31  ;;  %v1556_v48 = vadd.f32 %v1555_v46, %v2945_v33  ;;  %v1364_v49 = vpop.f32.mrb[99].mxu1  ;;  %v1557_v50 = vpop.f32.mrb[99].mxu0 }
 0x3e8   :  { %v2250_v51 = vpack.c.bf16 %v1361_v43, %v1359_v38  ;;  %v2251_v52 = vpack.c.bf16 %v1554_v44, %v1552_v40  ;;  %v1365_v53 = vadd.f32 %v1364_v49, %v2947_v34  ;;  %v1558_v54 = vadd.f32 %v1557_v50, %v2949_v36 }
 0x3ea   :  { %2022 = vst [vmem:[#allocation5 + $0x180] sm:$0xff] %v2250_v51  ;;  %2023 = vst [vmem:[#allocation5 + $0x188] sm:$0xff] %v2251_v52  ;;  %v2252_v55 = vpack.c.bf16 %v1365_v53, %v1363_v47  ;;  %v2253_v56 = vpack.c.bf16 %v1558_v54, %v1556_v48 }
 0x3ec   :  { %2024 = vst [vmem:[#allocation5 + $0x190] sm:$0xff] %v2252_v55  ;;  %2025 = vst [vmem:[#allocation5 + $0x198] sm:$0xff] %v2253_v56  ;;  %v1368_v57 = vpop.f32.mrb[100].mxu1  ;;  %v1561_v58 = vpop.f32.mrb[100].mxu0 }
 0x3ed   :  { %v1369_v59 = vadd.f32 %v1368_v57, %v2943_v31  ;;  %v1562_v60 = vadd.f32 %v1561_v58, %v2945_v33  ;;  %v1370_v61 = vpop.f32.mrb[101].mxu1  ;;  %v1563_v62 = vpop.f32.mrb[101].mxu0 }
 0x3ee   :  { %v1371_v63 = vadd.f32 %v1370_v61, %v2947_v34  ;;  %v1564_v0 = vadd.f32 %v1563_v62, %v2949_v36  ;;  %v1372_v1 = vpop.f32.mrb[102].mxu1  ;;  %v1565_v2 = vpop.f32.mrb[102].mxu0 }
 0x3ef   :  { %v1373_v3 = vadd.f32 %v1372_v1, %v2943_v31  ;;  %v1566_v4 = vadd.f32 %v1565_v2, %v2945_v33  ;;  %v1374_v5 = vpop.f32.mrb[103].mxu1  ;;  %v1567_v6 = vpop.f32.mrb[103].mxu0 }
 0x3f0   :  { %v2254_v8 = vpack.c.bf16 %v1371_v63, %v1369_v59  ;;  %v2255_v10 = vpack.c.bf16 %v1564_v0, %v1562_v60  ;;  %v1375_v11 = vadd.f32 %v1374_v5, %v2947_v34  ;;  %v1568_v12 = vadd.f32 %v1567_v6, %v2949_v36 }
 0x3f2   :  { %2026 = vst [vmem:[#allocation5 + $0x1a0] sm:$0xff] %v2254_v8  ;;  %2027 = vst [vmem:[#allocation5 + $0x1a8] sm:$0xff] %v2255_v10  ;;  %v2256_v13 = vpack.c.bf16 %v1375_v11, %v1373_v3  ;;  %v2257_v14 = vpack.c.bf16 %v1568_v12, %v1566_v4 }
 0x3f4   :  { %2028 = vst [vmem:[#allocation5 + $0x1b0] sm:$0xff] %v2256_v13  ;;  %2029 = vst [vmem:[#allocation5 + $0x1b8] sm:$0xff] %v2257_v14  ;;  %v1378_v15 = vpop.f32.mrb[104].mxu1  ;;  %v1571_v16 = vpop.f32.mrb[104].mxu0 }
 0x3f5   :  { %v1379_v17 = vadd.f32 %v1378_v15, %v2943_v31  ;;  %v1572_v18 = vadd.f32 %v1571_v16, %v2945_v33  ;;  %v1380_v19 = vpop.f32.mrb[105].mxu1  ;;  %v1573_v20 = vpop.f32.mrb[105].mxu0 }
 0x3f6   :  { %v1381_v32 = vadd.f32 %v1380_v19, %v2947_v34  ;;  %v1574_v9 = vadd.f32 %v1573_v20, %v2949_v36  ;;  %v1382_v7 = vpop.f32.mrb[106].mxu1  ;;  %v1575_v21 = vpop.f32.mrb[106].mxu0 }
 0x3f7   :  { %v1383_v22 = vadd.f32 %v1382_v7, %v2943_v31  ;;  %v1576_v23 = vadd.f32 %v1575_v21, %v2945_v33  ;;  %v1384_v24 = vpop.f32.mrb[107].mxu1  ;;  %v1577_v35 = vpop.f32.mrb[107].mxu0 }
 0x3f8   :  { %v2258_v25 = vpack.c.bf16 %v1381_v32, %v1379_v17  ;;  %v2259_v26 = vpack.c.bf16 %v1574_v9, %v1572_v18  ;;  %v1385_v27 = vadd.f32 %v1384_v24, %v2947_v34  ;;  %v1578_v28 = vadd.f32 %v1577_v35, %v2949_v36 }
 0x3fa   :  { %2030 = vst [vmem:[#allocation5 + $0x1c0] sm:$0xff] %v2258_v25  ;;  %2031 = vst [vmem:[#allocation5 + $0x1c8] sm:$0xff] %v2259_v26  ;;  %v2260_v29 = vpack.c.bf16 %v1385_v27, %v1383_v22  ;;  %v2261_v30 = vpack.c.bf16 %v1578_v28, %v1576_v23 }
 0x3fc   :  { %2032 = vst [vmem:[#allocation5 + $0x1d0] sm:$0xff] %v2260_v29  ;;  %2033 = vst [vmem:[#allocation5 + $0x1d8] sm:$0xff] %v2261_v30  ;;  %v1388_v39 = vpop.f32.mrb[108].mxu1  ;;  %v1581_v37 = vpop.f32.mrb[108].mxu0 }
 0x3fd   :  { %v1389_v38 = vadd.f32 %v1388_v39, %v2943_v31  ;;  %v1582_v40 = vadd.f32 %v1581_v37, %v2945_v33  ;;  %v1390_v41 = vpop.f32.mrb[109].mxu1  ;;  %v1583_v42 = vpop.f32.mrb[109].mxu0 }
 0x3fe   :  { %v1391_v43 = vadd.f32 %v1390_v41, %v2947_v34  ;;  %v1584_v44 = vadd.f32 %v1583_v42, %v2949_v36  ;;  %v1392_v45 = vpop.f32.mrb[110].mxu1  ;;  %v1585_v46 = vpop.f32.mrb[110].mxu0 }
 0x3ff   :  { %v1393_v47 = vadd.f32 %v1392_v45, %v2943_v31  ;;  %v1586_v48 = vadd.f32 %v1585_v46, %v2945_v33  ;;  %v1394_v49 = vpop.f32.mrb[111].mxu1  ;;  %v1587_v50 = vpop.f32.mrb[111].mxu0 }
 0x400   :  { %v2262_v51 = vpack.c.bf16 %v1391_v43, %v1389_v38  ;;  %v2263_v52 = vpack.c.bf16 %v1584_v44, %v1582_v40  ;;  %v1395_v53 = vadd.f32 %v1394_v49, %v2947_v34  ;;  %v1588_v54 = vadd.f32 %v1587_v50, %v2949_v36 }
 0x402   :  { %2034 = vst [vmem:[#allocation5 + $0x1e0] sm:$0xff] %v2262_v51  ;;  %2035 = vst [vmem:[#allocation5 + $0x1e8] sm:$0xff] %v2263_v52  ;;  %v2264_v55 = vpack.c.bf16 %v1395_v53, %v1393_v47  ;;  %v2265_v56 = vpack.c.bf16 %v1588_v54, %v1586_v48 }
 0x404   :  { %2036 = vst [vmem:[#allocation5 + $0x1f0] sm:$0xff] %v2264_v55  ;;  %2037 = vst [vmem:[#allocation5 + $0x1f8] sm:$0xff] %v2265_v56 }
 0x405   :  { %2583 = shalt.err (!%p2580_p12)
}
 0x406   :  { %s2584_s1 = scalar_lea.hbm %s3103_s9, 8192 }
 0x407   :  { %p2585_p13 = scmp.ne.s32.totalorder %s3103_s9, %s2584_s1  ;;  %p2588_p0 = scmp.lt.u32.totalorder %s2584_s1, %s3103_s9 }
 0x409   :  { %p2590_p1 = pnand %p2588_p0, %p2585_p13 }
 0x40b   :  { %2593 = shalt.err (!%p2590_p1)
}
 0x40c   :  { %2049 = dma.vmem_to_hbm [thread:$0]  %s2044_s28, 8192, %s3103_s9, [#allocation4], %s2599_s19, %s2599_s19, %s2600_s20  }
 0x40d   :  { %2596 = dma.done.wait [#allocation4], 8192  }
 0x40e   :  { %2597 = vsyncadd [#allocation4], 4294959104 }
 0x40f   :  { %2053 = vsyncpa [#allocation3], 1 }
 0x410   :  { %2054 = vsyncpa [#allocation4], 1 }

</bundles_post_ra>
